<compile_context>
chip_gen: v6e
topology: v6e:2x2x1
jax: 0.10.0
libtpu: 0.0.40
codegen_flags: <defaults>
</compile_context>

<pallas_src>
import functools
import numpy as np
import jax
import jax.numpy as jnp
from jax.experimental import pallas as pl
from jax.experimental.pallas import tpu as pltpu


_TILE_L = 512  # output rows per L-tile (multiple of 8; sized well below VMEM budget)


def _vmem_limit_bytes():
    # v5e/v6e: 128 MiB physical -> ~96 MiB scoped; v7x: 64 MiB -> ~48 MiB.
    try:
        cap = int(pltpu.get_tpu_info().vmem_capacity_bytes)
    except Exception:
        cap = 64 * 1024 * 1024
    return int(min(cap * 3 // 4, 100 * 1024 * 1024))


_COMPILER_PARAMS = pltpu.CompilerParams(
    dimension_semantics=("parallel", "parallel"),
    vmem_limit_bytes=_vmem_limit_bytes())


def _round_up(x, m):
    return ((x + m - 1) // m) * m


def _tiling(l_out, halo, tile_l):
    """Pick (tile T, num_tiles, halo block B): B multiple of 8, B >= halo, B | T."""
    b = 0
    if halo > 0:
        b = 8
        while b < halo:
            b *= 2
    step = max(b, 8)
    t = min(_round_up(tile_l, step), _round_up(l_out, step))
    num_tiles = -(-l_out // t)
    return t, num_tiles, b


def _leaky_relu(y):
    return jnp.where(y > 0, y, 0.2 * y)


def _im2col(window_f32, k, dilation, rows):
    """window_f32: (>= rows + dilation*(k-1), Cin) f32 -> (rows, k*Cin) f32."""
    if k == 1:
        return window_f32[:rows, :]
    pieces = [window_f32[i * dilation:i * dilation + rows, :] for i in range(k)]
    return jnp.concatenate(pieces, axis=-1)


# ----------------------------------------------------------------------------
# Kernels
# ----------------------------------------------------------------------------
def _make_conv_kernel(*, K, dilation, T, B_halo, apply_act):
    """Stride-1 conv (im2col, single MXU matmul) + folded-BN affine + LeakyReLU."""

    def kernel(*refs):
        if B_halo > 0:
            x_ref, halo_ref, w_ref, s_ref, b_ref, o_ref = refs
            window = jnp.concatenate(
                [x_ref[...].astype(jnp.float32), halo_ref[...].astype(jnp.float32)],
                axis=0)                                         # (T + B_halo, Cin)
        else:
            x_ref, w_ref, s_ref, b_ref, o_ref = refs
            window = x_ref[...].astype(jnp.float32)             # (T, Cin)

        cols = _im2col(window, K, dilation, T)                  # (T, K*Cin)
        acc = jnp.dot(cols.astype(jnp.bfloat16), w_ref[...],
                      preferred_element_type=jnp.float32)       # (T, Cout) f32
        y = acc * s_ref[...] + b_ref[...]                       # folded conv-bias + BN
        if apply_act:
            y = _leaky_relu(y)
        o_ref[...] = y.astype(o_ref.dtype)

    return kernel


def _make_res_block_kernel(*, dilation, T, B_halo):
    """Fused ResidualBlock: conv1+BN1+act -> conv2+BN2 (+x) -> act, h stays in VMEM."""
    d = dilation

    def kernel(x_ref, halo_ref, w1_ref, s1_ref, b1_ref, w2_ref, s2_ref, b2_ref, o_ref):
        window = jnp.concatenate(
            [x_ref[...].astype(jnp.float32), halo_ref[...].astype(jnp.float32)],
            axis=0)                                             # (T + B_halo, C)

        # conv1 over T + 2d rows (the extra rows are the halo conv2 needs).
        cols1 = _im2col(window, 3, d, T + 2 * d)                # (T+2d, 3C)
        h = jnp.dot(cols1.astype(jnp.bfloat16), w1_ref[...],
                    preferred_element_type=jnp.float32)
        h = _leaky_relu(h * s1_ref[...] + b1_ref[...])          # (T+2d, C) f32

        # conv2 over the central T rows, then residual add and activation.
        cols2 = _im2col(h, 3, d, T)                             # (T, 3C)
        y = jnp.dot(cols2.astype(jnp.bfloat16), w2_ref[...],
                    preferred_element_type=jnp.float32)
        y = y * s2_ref[...] + b2_ref[...]
        y = y + window[2 * d:2 * d + T, :]                      # residual == x tile
        o_ref[...] = _leaky_relu(y).astype(o_ref.dtype)

    return kernel


# ----------------------------------------------------------------------------
# pallas_call wrappers (halo tiling: same array passed twice, main + halo block)
# ----------------------------------------------------------------------------
def _conv_pallas(x_ext, w2d, scale, bias, *, K, dilation, L_out, T, num_tiles, B,
                 apply_act, out_dtype):
    """x_ext: (N, num_tiles*T + B, Cin), zero-extended so output row j's first
    conv tap reads row j.  Returns (N, L_out, Cout)."""
    N, _, Cin = x_ext.shape
    KC, Cout = w2d.shape
    kernel = _make_conv_kernel(K=K, dilation=dilation, T=T, B_halo=B,
                               apply_act=apply_act)

    in_specs = [pl.BlockSpec((pl.Squeezed(), T, Cin), lambda n, t: (n, t, 0))]
    inputs = [x_ext]
    if B > 0:
        r = T // B
        in_specs.append(pl.BlockSpec((pl.Squeezed(), B, Cin),
                                     lambda n, t: (n, (t + 1) * r, 0)))
        inputs.append(x_ext)
    in_specs += [
        pl.BlockSpec((KC, Cout), lambda n, t: (0, 0)),
        pl.BlockSpec((1, Cout), lambda n, t: (0, 0)),
        pl.BlockSpec((1, Cout), lambda n, t: (0, 0)),
    ]
    inputs += [w2d, scale, bias]

    out = pl.pallas_call(
        kernel,
        out_shape=jax.ShapeDtypeStruct((N, num_tiles * T, Cout), out_dtype),
        grid=(N, num_tiles),
        in_specs=in_specs,
        out_specs=pl.BlockSpec((pl.Squeezed(), T, Cout), lambda n, t: (n, t, 0)),
        compiler_params=_COMPILER_PARAMS,
    )(*inputs)
    return out[:, :L_out, :]


def conv_bn_act(x, params, *, K, dilation=1, padding=0, apply_act=True,
                out_dtype=jnp.bfloat16, tile_l=_TILE_L):
    """Stride-1 Conv1d + folded BatchNorm + optional LeakyReLU.  x: (N, L, Cin)."""
    w2d, scale, bias = params
    N, Lx, _ = x.shape
    halo = dilation * (K - 1)
    L_out = Lx + 2 * padding - halo
    T, num_tiles, B = _tiling(L_out, halo, tile_l)
    P = num_tiles * T + B
    x_ext = jnp.pad(x.astype(jnp.bfloat16),
                    ((0, 0), (padding, P - padding - Lx), (0, 0)))
    return _conv_pallas(x_ext, w2d, scale, bias, K=K, dilation=dilation,
                        L_out=L_out, T=T, num_tiles=num_tiles, B=B,
                        apply_act=apply_act, out_dtype=out_dtype)


def downsample_bn_act(x, params, *, out_dtype=jnp.bfloat16, tile_l=_TILE_L):
    """Conv1d(K=4, stride=2, padding=1) + BN + LeakyReLU with the stride folded
    into channels (pair view) -> stride-1, K=2, Cin'=2*Cin conv."""
    w2d, scale, bias = params                       # (4*Cin, Cout)
    N, Lx, Cin = x.shape
    L_out = Lx // 2
    halo = 1                                        # in pair-row units
    T, num_tiles, B = _tiling(L_out, halo, tile_l)
    P = num_tiles * T + B                           # pair rows
    x_s = jnp.pad(x.astype(jnp.bfloat16), ((0, 0), (1, 2 * P - 1 - Lx), (0, 0)))
    x_pair = x_s.reshape(N, P, 2 * Cin)             # free reshape (C is minor dim)
    return _conv_pallas(x_pair, w2d, scale, bias, K=2, dilation=1,
                        L_out=L_out, T=T, num_tiles=num_tiles, B=B,
                        apply_act=True, out_dtype=out_dtype)


def residual_block(x, p1, p2, *, dilation, out_dtype=jnp.bfloat16, tile_l=_TILE_L):
    """Fused ResidualBlock; the intermediate activation never round-trips HBM."""
    w1, s1, b1 = p1
    w2, s2, b2 = p2
    N, Lx, C = x.shape
    d = dilation
    halo = 4 * d                                    # 2d halo per conv
    L_out = Lx
    T, num_tiles, B = _tiling(L_out, halo, tile_l)
    P = num_tiles * T + B
    x_ext = jnp.pad(x.astype(jnp.bfloat16), ((0, 0), (2 * d, P - 2 * d - Lx), (0, 0)))
    r = T // B
    kernel = _make_res_block_kernel(dilation=d, T=T, B_halo=B)
    out = pl.pallas_call(
        kernel,
        out_shape=jax.ShapeDtypeStruct((N, num_tiles * T, C), out_dtype),
        grid=(N, num_tiles),
        in_specs=[
            pl.BlockSpec((pl.Squeezed(), T, C), lambda n, t: (n, t, 0)),
            pl.BlockSpec((pl.Squeezed(), B, C), lambda n, t: (n, (t + 1) * r, 0)),
            pl.BlockSpec(w1.shape, lambda n, t: (0, 0)),
            pl.BlockSpec((1, C), lambda n, t: (0, 0)),
            pl.BlockSpec((1, C), lambda n, t: (0, 0)),
            pl.BlockSpec(w2.shape, lambda n, t: (0, 0)),
            pl.BlockSpec((1, C), lambda n, t: (0, 0)),
            pl.BlockSpec((1, C), lambda n, t: (0, 0)),
        ],
        out_specs=pl.BlockSpec((pl.Squeezed(), T, C), lambda n, t: (n, t, 0)),
        compiler_params=_COMPILER_PARAMS,
    )(x_ext, x_ext, w1, s1, b1, w2, s2, b2)
    return out[:, :L_out, :]


# ----------------------------------------------------------------------------
# Deterministic parameter init (Conv1d weight/bias + BatchNorm folded affine)
# ----------------------------------------------------------------------------
def init_conv_bn(key, cin, cout, k):
    k1, k2, k3, k4, k5, k6 = jax.random.split(key, 6)
    w = jax.random.normal(k1, (cout, cin, k), jnp.float32) / np.sqrt(cin * k)
    b = 0.1 * jax.random.normal(k2, (cout,), jnp.float32)
    gamma = 1.0 + 0.1 * jax.random.normal(k3, (cout,), jnp.float32)
    beta = 0.1 * jax.random.normal(k4, (cout,), jnp.float32)
    rmean = 0.1 * jax.random.normal(k5, (cout,), jnp.float32)
    rvar = jnp.abs(1.0 + 0.1 * jax.random.normal(k6, (cout,), jnp.float32))
    eps = 1e-5
    s = gamma / jnp.sqrt(rvar + eps)
    scale = s.reshape(1, cout)
    bias = ((b - rmean) * s + beta).reshape(1, cout)
    # (Cout, Cin, K) -> (K, Cin, Cout) -> (K*Cin, Cout): tap-major im2col order.
    w2d = jnp.transpose(w, (2, 1, 0)).reshape(k * cin, cout).astype(jnp.bfloat16)
    return w2d, scale, bias


def init_encoder_params(key, in_channels, channels, latent_dim, n_residual_blocks):
    keys = jax.random.split(key, 6 + 2 * n_residual_blocks)
    params = {}
    params["conv_in"] = init_conv_bn(keys[0], in_channels, channels, 7)
    for i in range(4):
        params[f"down{i + 1}"] = init_conv_bn(keys[1 + i], channels, channels, 4)
    res = []
    for i in range(n_residual_blocks):
        dil = 2 ** i
        p1 = init_conv_bn(keys[5 + 2 * i], channels, channels, 3)
        p2 = init_conv_bn(keys[6 + 2 * i], channels, channels, 3)
        res.append((p1, p2, dil))
    params["res"] = res
    params["conv_out"] = init_conv_bn(keys[5 + 2 * n_residual_blocks],
                                      channels, latent_dim * 2, 3)
    return params


# ----------------------------------------------------------------------------
# Encoder forward pass (matches the PyTorch module's forward semantics)
# ----------------------------------------------------------------------------
def encoder_forward(x_ncl, params, *, tile_l=_TILE_L):
    """x_ncl: (N, in_channels, L).  Returns (mean, log_var), each (N, latent, L//16)."""
    N, Cin, L = x_ncl.shape

    if Cin == 1:
        # conv_in (K=7, Cin=1): im2col the 1-channel signal on the host so the
        # kernel sees a pure lane-dense (L, 7) @ (7, C) MXU matmul.
        xp = jnp.pad(x_ncl[:, 0, :].astype(jnp.float32), ((0, 0), (3, 3)))
        x = jnp.stack([xp[:, k:k + L] for k in range(7)], axis=-1)   # (N, L, 7)
        x = conv_bn_act(x, params["conv_in"], K=1, tile_l=tile_l)
    else:
        x = jnp.transpose(x_ncl, (0, 2, 1)).astype(jnp.float32)
        x = conv_bn_act(x, params["conv_in"], K=7, padding=3, tile_l=tile_l)

    for i in range(1, 5):
        x = downsample_bn_act(x, params[f"down{i}"], tile_l=tile_l)

    for (p1, p2, dil) in params["res"]:
        x = residual_block(x, p1, p2, dilation=dil, tile_l=tile_l)

    x = conv_bn_act(x, params["conv_out"], K=3, padding=1, apply_act=True,
                    out_dtype=jnp.float32, tile_l=tile_l)

    mean, log_var = jnp.split(x, 2, axis=-1)                # chunk along channels
    # back to PyTorch (N, C, L) layout
    return jnp.transpose(mean, (0, 2, 1)), jnp.transpose(log_var, (0, 2, 1))


if __name__ == "__main__":
    key = jax.random.PRNGKey(0)
    k_x, k_p = jax.random.split(key)

    # Small shapes consistent with the module: (batch, in_channels, seq_len)
    N, IN_CH, L = 2, 1, 64
    CHANNELS, LATENT, N_RES = 32, 16, 2

    x = jax.random.normal(k_x, (N, IN_CH, L), jnp.float32)
    params = init_encoder_params(k_p, IN_CH, CHANNELS, LATENT, N_RES)

    fwd = jax.jit(functools.partial(encoder_forward, params=params))
    mean, log_var = fwd(x)
    jax.block_until_ready((mean, log_var))

    L_out = L // 16  # four stride-2 downsamples
    assert mean.shape == (N, LATENT, L_out), mean.shape
    assert log_var.shape == (N, LATENT, L_out), log_var.shape
    assert bool(jnp.all(jnp.isfinite(mean))) and bool(jnp.all(jnp.isfinite(log_var)))
    print("KERNEL_OK")
</pallas_src>

<mosaic_0001>
module attributes {stable_mosaic.version = 11 : i64} {
  func.func @kernel(%arg0: i32, %arg1: i32, %arg2: memref<1x32x64xbf16, #tpu.memory_space<vmem>>, %arg3: memref<1x8x64xbf16, #tpu.memory_space<vmem>>, %arg4: memref<128x32xbf16, #tpu.memory_space<vmem>>, %arg5: memref<1x32xf32, #tpu.memory_space<vmem>>, %arg6: memref<1x32xf32, #tpu.memory_space<vmem>>, %arg7: memref<1x32x32xbf16, #tpu.memory_space<vmem>>) attributes {dimension_semantics = [#tpu.dimension_semantics<parallel>, #tpu.dimension_semantics<parallel>], iteration_bounds = array<i64: 2, 1>, scalar_prefetch = 0 : i64, scratch_operands = 0 : i64, tpu.core_type = #tpu.core_type<tc>, window_params = [{transform_indices = @transform_0, window_bounds = array<i64: 1, 32, 64>}, {transform_indices = @transform_1, window_bounds = array<i64: 1, 8, 64>}, {pipeline_mode = #tpu.pipeline_mode<synchronous>, transform_indices = @transform_2, window_bounds = array<i64: 128, 32>}, {pipeline_mode = #tpu.pipeline_mode<synchronous>, transform_indices = @transform_3, window_bounds = array<i64: 1, 32>}, {pipeline_mode = #tpu.pipeline_mode<synchronous>, transform_indices = @transform_4, window_bounds = array<i64: 1, 32>}, {transform_indices = @transform_5, window_bounds = array<i64: 1, 32, 32>}]} {
    %c0 = arith.constant 0 : index
    %c0_0 = arith.constant 0 : index
    %c0_1 = arith.constant 0 : index
    %0 = vector.load %arg2[%c0, %c0_0, %c0_1] : memref<1x32x64xbf16, #tpu.memory_space<vmem>>, vector<1x32x64xbf16>
    %1 = vector.shape_cast %0 : vector<1x32x64xbf16> to vector<32x64xbf16>
    %2 = arith.extf %1 : vector<32x64xbf16> to vector<32x64xf32>
    %c0_2 = arith.constant 0 : index
    %c0_3 = arith.constant 0 : index
    %c0_4 = arith.constant 0 : index
    %3 = vector.load %arg3[%c0_2, %c0_3, %c0_4] : memref<1x8x64xbf16, #tpu.memory_space<vmem>>, vector<1x8x64xbf16>
    %4 = vector.shape_cast %3 : vector<1x8x64xbf16> to vector<8x64xbf16>
    %5 = arith.extf %4 : vector<8x64xbf16> to vector<8x64xf32>
    %6 = tpu.concatenate %2, %5 in 0 : vector<32x64xf32>, vector<8x64xf32> -> vector<40x64xf32>
    %7 = vector.extract_strided_slice %6 {offsets = [0, 0], sizes = [32, 64], strides = [1, 1]} : vector<40x64xf32> to vector<32x64xf32>
    %8 = vector.extract_strided_slice %6 {offsets = [1, 0], sizes = [32, 64], strides = [1, 1]} : vector<40x64xf32> to vector<32x64xf32>
    %9 = tpu.concatenate %7, %8 in 1 : vector<32x64xf32>, vector<32x64xf32> -> vector<32x128xf32>
    %10 = arith.truncf %9 : vector<32x128xf32> to vector<32x128xbf16>
    %c0_5 = arith.constant 0 : index
    %c0_6 = arith.constant 0 : index
    %11 = vector.load %arg4[%c0_5, %c0_6] : memref<128x32xbf16, #tpu.memory_space<vmem>>, vector<128x32xbf16>
    %cst = arith.constant dense<0.000000e+00> : vector<32x32xf32>
    %12 = tpu.matmul %10, %11, %cst {dimension_numbers = #tpu.dot_dimension_numbers<[1], [0], [0], [1], [0, 0, 1, 1], [], []>} : vector<32x128xbf16>, vector<128x32xbf16>, vector<32x32xf32> -> vector<32x32xf32>
    %c0_7 = arith.constant 0 : index
    %c0_8 = arith.constant 0 : index
    %13 = vector.load %arg5[%c0_7, %c0_8] : memref<1x32xf32, #tpu.memory_space<vmem>>, vector<1x32xf32>
    %14 = vector.broadcast %13 : vector<1x32xf32> to vector<32x32xf32>
    %15 = arith.mulf %12, %14 : vector<32x32xf32>
    %c0_9 = arith.constant 0 : index
    %c0_10 = arith.constant 0 : index
    %16 = vector.load %arg6[%c0_9, %c0_10] : memref<1x32xf32, #tpu.memory_space<vmem>>, vector<1x32xf32>
    %17 = vector.broadcast %16 : vector<1x32xf32> to vector<32x32xf32>
    %18 = arith.addf %15, %17 : vector<32x32xf32>
    %cst_11 = arith.constant 0.000000e+00 : f32
    %19 = vector.broadcast %cst_11 : f32 to vector<32x32xf32>
    %20 = arith.cmpf ogt, %18, %19 : vector<32x32xf32>
    %cst_12 = arith.constant 2.000000e-01 : f32
    %21 = vector.broadcast %cst_12 : f32 to vector<32x32xf32>
    %22 = arith.mulf %21, %18 : vector<32x32xf32>
    %23 = arith.select %20, %18, %22 : vector<32x32xi1>, vector<32x32xf32>
    %24 = arith.truncf %23 : vector<32x32xf32> to vector<32x32xbf16>
    %c0_13 = arith.constant 0 : index
    %c0_14 = arith.constant 0 : index
    %c0_15 = arith.constant 0 : index
    %25 = vector.load %arg7[%c0_13, %c0_14, %c0_15] : memref<1x32x32xbf16, #tpu.memory_space<vmem>>, vector<1x32x32xbf16>
    %26 = vector.shape_cast %25 : vector<1x32x32xbf16> to vector<32x32xbf16>
    %27 = vector.shape_cast %24 : vector<32x32xbf16> to vector<1x32x32xbf16>
    tpu.vector_store %arg7[%c0_13, %c0_14, %c0_15], %27 {strides = array<i32>} : memref<1x32x32xbf16, #tpu.memory_space<vmem>>, vector<1x32x32xbf16>,
    return
  }
  func.func @transform_0(%arg0: i32, %arg1: i32) -> (i32, i32, i32) {
    %c0_i32 = arith.constant 0 : i32
    %c0_i32_0 = arith.constant 0 : i32
    return %arg0, %arg1, %c0_i32 : i32, i32, i32
  }
  func.func @transform_1(%arg0: i32, %arg1: i32) -> (i32, i32, i32) {
    %c1_i32 = arith.constant 1 : i32
    %0 = arith.addi %arg1, %c1_i32 : i32
    %c4_i32 = arith.constant 4 : i32
    %1 = arith.muli %0, %c4_i32 : i32
    %c0_i32 = arith.constant 0 : i32
    %c0_i32_0 = arith.constant 0 : i32
    return %arg0, %1, %c0_i32 : i32, i32, i32
  }
  func.func @transform_2(%arg0: i32, %arg1: i32) -> (i32, i32) {
    %c0_i32 = arith.constant 0 : i32
    %c0_i32_0 = arith.constant 0 : i32
    %c0_i32_1 = arith.constant 0 : i32
    return %c0_i32, %c0_i32_0 : i32, i32
  }
  func.func @transform_3(%arg0: i32, %arg1: i32) -> (i32, i32) {
    %c0_i32 = arith.constant 0 : i32
    %c0_i32_0 = arith.constant 0 : i32
    %c0_i32_1 = arith.constant 0 : i32
    return %c0_i32, %c0_i32_0 : i32, i32
  }
  func.func @transform_4(%arg0: i32, %arg1: i32) -> (i32, i32) {
    %c0_i32 = arith.constant 0 : i32
    %c0_i32_0 = arith.constant 0 : i32
    %c0_i32_1 = arith.constant 0 : i32
    return %c0_i32, %c0_i32_0 : i32, i32
  }
  func.func @transform_5(%arg0: i32, %arg1: i32) -> (i32, i32, i32) {
    %c0_i32 = arith.constant 0 : i32
    %c0_i32_0 = arith.constant 0 : i32
    return %arg0, %arg1, %c0_i32 : i32, i32, i32
  }
}

module attributes {stable_mosaic.version = 11 : i64} {
  func.func @kernel(%arg0: i32, %arg1: i32, %arg2: memref<1x64x7xbf16, #tpu.memory_space<vmem>>, %arg3: memref<7x32xbf16, #tpu.memory_space<vmem>>, %arg4: memref<1x32xf32, #tpu.memory_space<vmem>>, %arg5: memref<1x32xf32, #tpu.memory_space<vmem>>, %arg6: memref<1x64x32xbf16, #tpu.memory_space<vmem>>) attributes {dimension_semantics = [#tpu.dimension_semantics<parallel>, #tpu.dimension_semantics<parallel>], iteration_bounds = array<i64: 2, 1>, scalar_prefetch = 0 : i64, scratch_operands = 0 : i64, tpu.core_type = #tpu.core_type<tc>, window_params = [{transform_indices = @transform_0, window_bounds = array<i64: 1, 64, 7>}, {pipeline_mode = #tpu.pipeline_mode<synchronous>, transform_indices = @transform_1, window_bounds = array<i64: 7, 32>}, {pipeline_mode = #tpu.pipeline_mode<synchronous>, transform_indices = @transform_2, window_bounds = array<i64: 1, 32>}, {pipeline_mode = #tpu.pipeline_mode<synchronous>, transform_indices = @transform_3, window_bounds = array<i64: 1, 32>}, {transform_indices = @transform_4, window_bounds = array<i64: 1, 64, 32>}]} {
    %c0 = arith.constant 0 : index
    %c0_0 = arith.constant 0 : index
    %c0_1 = arith.constant 0 : index
    %0 = vector.load %arg2[%c0, %c0_0, %c0_1] : memref<1x64x7xbf16, #tpu.memory_space<vmem>>, vector<1x64x7xbf16>
    %1 = vector.shape_cast %0 : vector<1x64x7xbf16> to vector<64x7xbf16>
    %2 = arith.extf %1 : vector<64x7xbf16> to vector<64x7xf32>
    %3 = arith.truncf %2 : vector<64x7xf32> to vector<64x7xbf16>
    %c0_2 = arith.constant 0 : index
    %c0_3 = arith.constant 0 : index
    %4 = vector.load %arg3[%c0_2, %c0_3] : memref<7x32xbf16, #tpu.memory_space<vmem>>, vector<7x32xbf16>
    %cst = arith.constant dense<0.000000e+00> : vector<64x32xf32>
    %5 = tpu.matmul %3, %4, %cst {dimension_numbers = #tpu.dot_dimension_numbers<[1], [0], [0], [1], [0, 0, 1, 1], [], []>} : vector<64x7xbf16>, vector<7x32xbf16>, vector<64x32xf32> -> vector<64x32xf32>
    %c0_4 = arith.constant 0 : index
    %c0_5 = arith.constant 0 : index
    %6 = vector.load %arg4[%c0_4, %c0_5] : memref<1x32xf32, #tpu.memory_space<vmem>>, vector<1x32xf32>
    %7 = vector.broadcast %6 : vector<1x32xf32> to vector<64x32xf32>
    %8 = arith.mulf %5, %7 : vector<64x32xf32>
    %c0_6 = arith.constant 0 : index
    %c0_7 = arith.constant 0 : index
    %9 = vector.load %arg5[%c0_6, %c0_7] : memref<1x32xf32, #tpu.memory_space<vmem>>, vector<1x32xf32>
    %10 = vector.broadcast %9 : vector<1x32xf32> to vector<64x32xf32>
    %11 = arith.addf %8, %10 : vector<64x32xf32>
    %cst_8 = arith.constant 0.000000e+00 : f32
    %12 = vector.broadcast %cst_8 : f32 to vector<64x32xf32>
    %13 = arith.cmpf ogt, %11, %12 : vector<64x32xf32>
    %cst_9 = arith.constant 2.000000e-01 : f32
    %14 = vector.broadcast %cst_9 : f32 to vector<64x32xf32>
    %15 = arith.mulf %14, %11 : vector<64x32xf32>
    %16 = arith.select %13, %11, %15 : vector<64x32xi1>, vector<64x32xf32>
    %17 = arith.truncf %16 : vector<64x32xf32> to vector<64x32xbf16>
    %c0_10 = arith.constant 0 : index
    %c0_11 = arith.constant 0 : index
    %c0_12 = arith.constant 0 : index
    %18 = vector.load %arg6[%c0_10, %c0_11, %c0_12] : memref<1x64x32xbf16, #tpu.memory_space<vmem>>, vector<1x64x32xbf16>
    %19 = vector.shape_cast %18 : vector<1x64x32xbf16> to vector<64x32xbf16>
    %20 = vector.shape_cast %17 : vector<64x32xbf16> to vector<1x64x32xbf16>
    tpu.vector_store %arg6[%c0_10, %c0_11, %c0_12], %20 {strides = array<i32>} : memref<1x64x32xbf16, #tpu.memory_space<vmem>>, vector<1x64x32xbf16>,
    return
  }
  func.func @transform_0(%arg0: i32, %arg1: i32) -> (i32, i32, i32) {
    %c0_i32 = arith.constant 0 : i32
    %c0_i32_0 = arith.constant 0 : i32
    return %arg0, %arg1, %c0_i32 : i32, i32, i32
  }
  func.func @transform_1(%arg0: i32, %arg1: i32) -> (i32, i32) {
    %c0_i32 = arith.constant 0 : i32
    %c0_i32_0 = arith.constant 0 : i32
    %c0_i32_1 = arith.constant 0 : i32
    return %c0_i32, %c0_i32_0 : i32, i32
  }
  func.func @transform_2(%arg0: i32, %arg1: i32) -> (i32, i32) {
    %c0_i32 = arith.constant 0 : i32
    %c0_i32_0 = arith.constant 0 : i32
    %c0_i32_1 = arith.constant 0 : i32
    return %c0_i32, %c0_i32_0 : i32, i32
  }
  func.func @transform_3(%arg0: i32, %arg1: i32) -> (i32, i32) {
    %c0_i32 = arith.constant 0 : i32
    %c0_i32_0 = arith.constant 0 : i32
    %c0_i32_1 = arith.constant 0 : i32
    return %c0_i32, %c0_i32_0 : i32, i32
  }
  func.func @transform_4(%arg0: i32, %arg1: i32) -> (i32, i32, i32) {
    %c0_i32 = arith.constant 0 : i32
    %c0_i32_0 = arith.constant 0 : i32
    return %arg0, %arg1, %c0_i32 : i32, i32, i32
  }
}

module attributes {stable_mosaic.version = 11 : i64} {
  func.func @kernel(%arg0: i32, %arg1: i32, %arg2: memref<1x16x64xbf16, #tpu.memory_space<vmem>>, %arg3: memref<1x8x64xbf16, #tpu.memory_space<vmem>>, %arg4: memref<128x32xbf16, #tpu.memory_space<vmem>>, %arg5: memref<1x32xf32, #tpu.memory_space<vmem>>, %arg6: memref<1x32xf32, #tpu.memory_space<vmem>>, %arg7: memref<1x16x32xbf16, #tpu.memory_space<vmem>>) attributes {dimension_semantics = [#tpu.dimension_semantics<parallel>, #tpu.dimension_semantics<parallel>], iteration_bounds = array<i64: 2, 1>, scalar_prefetch = 0 : i64, scratch_operands = 0 : i64, tpu.core_type = #tpu.core_type<tc>, window_params = [{transform_indices = @transform_0, window_bounds = array<i64: 1, 16, 64>}, {transform_indices = @transform_1, window_bounds = array<i64: 1, 8, 64>}, {pipeline_mode = #tpu.pipeline_mode<synchronous>, transform_indices = @transform_2, window_bounds = array<i64: 128, 32>}, {pipeline_mode = #tpu.pipeline_mode<synchronous>, transform_indices = @transform_3, window_bounds = array<i64: 1, 32>}, {pipeline_mode = #tpu.pipeline_mode<synchronous>, transform_indices = @transform_4, window_bounds = array<i64: 1, 32>}, {transform_indices = @transform_5, window_bounds = array<i64: 1, 16, 32>}]} {
    %c0 = arith.constant 0 : index
    %c0_0 = arith.constant 0 : index
    %c0_1 = arith.constant 0 : index
    %0 = vector.load %arg2[%c0, %c0_0, %c0_1] : memref<1x16x64xbf16, #tpu.memory_space<vmem>>, vector<1x16x64xbf16>
    %1 = vector.shape_cast %0 : vector<1x16x64xbf16> to vector<16x64xbf16>
    %2 = arith.extf %1 : vector<16x64xbf16> to vector<16x64xf32>
    %c0_2 = arith.constant 0 : index
    %c0_3 = arith.constant 0 : index
    %c0_4 = arith.constant 0 : index
    %3 = vector.load %arg3[%c0_2, %c0_3, %c0_4] : memref<1x8x64xbf16, #tpu.memory_space<vmem>>, vector<1x8x64xbf16>
    %4 = vector.shape_cast %3 : vector<1x8x64xbf16> to vector<8x64xbf16>
    %5 = arith.extf %4 : vector<8x64xbf16> to vector<8x64xf32>
    %6 = tpu.concatenate %2, %5 in 0 : vector<16x64xf32>, vector<8x64xf32> -> vector<24x64xf32>
    %7 = vector.extract_strided_slice %6 {offsets = [0, 0], sizes = [16, 64], strides = [1, 1]} : vector<24x64xf32> to vector<16x64xf32>
    %8 = vector.extract_strided_slice %6 {offsets = [1, 0], sizes = [16, 64], strides = [1, 1]} : vector<24x64xf32> to vector<16x64xf32>
    %9 = tpu.concatenate %7, %8 in 1 : vector<16x64xf32>, vector<16x64xf32> -> vector<16x128xf32>
    %10 = arith.truncf %9 : vector<16x128xf32> to vector<16x128xbf16>
    %c0_5 = arith.constant 0 : index
    %c0_6 = arith.constant 0 : index
    %11 = vector.load %arg4[%c0_5, %c0_6] : memref<128x32xbf16, #tpu.memory_space<vmem>>, vector<128x32xbf16>
    %cst = arith.constant dense<0.000000e+00> : vector<16x32xf32>
    %12 = tpu.matmul %10, %11, %cst {dimension_numbers = #tpu.dot_dimension_numbers<[1], [0], [0], [1], [0, 0, 1, 1], [], []>} : vector<16x128xbf16>, vector<128x32xbf16>, vector<16x32xf32> -> vector<16x32xf32>
    %c0_7 = arith.constant 0 : index
    %c0_8 = arith.constant 0 : index
    %13 = vector.load %arg5[%c0_7, %c0_8] : memref<1x32xf32, #tpu.memory_space<vmem>>, vector<1x32xf32>
    %14 = vector.broadcast %13 : vector<1x32xf32> to vector<16x32xf32>
    %15 = arith.mulf %12, %14 : vector<16x32xf32>
    %c0_9 = arith.constant 0 : index
    %c0_10 = arith.constant 0 : index
    %16 = vector.load %arg6[%c0_9, %c0_10] : memref<1x32xf32, #tpu.memory_space<vmem>>, vector<1x32xf32>
    %17 = vector.broadcast %16 : vector<1x32xf32> to vector<16x32xf32>
    %18 = arith.addf %15, %17 : vector<16x32xf32>
    %cst_11 = arith.constant 0.000000e+00 : f32
    %19 = vector.broadcast %cst_11 : f32 to vector<16x32xf32>
    %20 = arith.cmpf ogt, %18, %19 : vector<16x32xf32>
    %cst_12 = arith.constant 2.000000e-01 : f32
    %21 = vector.broadcast %cst_12 : f32 to vector<16x32xf32>
    %22 = arith.mulf %21, %18 : vector<16x32xf32>
    %23 = arith.select %20, %18, %22 : vector<16x32xi1>, vector<16x32xf32>
    %24 = arith.truncf %23 : vector<16x32xf32> to vector<16x32xbf16>
    %c0_13 = arith.constant 0 : index
    %c0_14 = arith.constant 0 : index
    %c0_15 = arith.constant 0 : index
    %25 = vector.load %arg7[%c0_13, %c0_14, %c0_15] : memref<1x16x32xbf16, #tpu.memory_space<vmem>>, vector<1x16x32xbf16>
    %26 = vector.shape_cast %25 : vector<1x16x32xbf16> to vector<16x32xbf16>
    %27 = vector.shape_cast %24 : vector<16x32xbf16> to vector<1x16x32xbf16>
    tpu.vector_store %arg7[%c0_13, %c0_14, %c0_15], %27 {strides = array<i32>} : memref<1x16x32xbf16, #tpu.memory_space<vmem>>, vector<1x16x32xbf16>,
    return
  }
  func.func @transform_0(%arg0: i32, %arg1: i32) -> (i32, i32, i32) {
    %c0_i32 = arith.constant 0 : i32
    %c0_i32_0 = arith.constant 0 : i32
    return %arg0, %arg1, %c0_i32 : i32, i32, i32
  }
  func.func @transform_1(%arg0: i32, %arg1: i32) -> (i32, i32, i32) {
    %c1_i32 = arith.constant 1 : i32
    %0 = arith.addi %arg1, %c1_i32 : i32
    %c2_i32 = arith.constant 2 : i32
    %1 = arith.muli %0, %c2_i32 : i32
    %c0_i32 = arith.constant 0 : i32
    %c0_i32_0 = arith.constant 0 : i32
    return %arg0, %1, %c0_i32 : i32, i32, i32
  }
  func.func @transform_2(%arg0: i32, %arg1: i32) -> (i32, i32) {
    %c0_i32 = arith.constant 0 : i32
    %c0_i32_0 = arith.constant 0 : i32
    %c0_i32_1 = arith.constant 0 : i32
    return %c0_i32, %c0_i32_0 : i32, i32
  }
  func.func @transform_3(%arg0: i32, %arg1: i32) -> (i32, i32) {
    %c0_i32 = arith.constant 0 : i32
    %c0_i32_0 = arith.constant 0 : i32
    %c0_i32_1 = arith.constant 0 : i32
    return %c0_i32, %c0_i32_0 : i32, i32
  }
  func.func @transform_4(%arg0: i32, %arg1: i32) -> (i32, i32) {
    %c0_i32 = arith.constant 0 : i32
    %c0_i32_0 = arith.constant 0 : i32
    %c0_i32_1 = arith.constant 0 : i32
    return %c0_i32, %c0_i32_0 : i32, i32
  }
  func.func @transform_5(%arg0: i32, %arg1: i32) -> (i32, i32, i32) {
    %c0_i32 = arith.constant 0 : i32
    %c0_i32_0 = arith.constant 0 : i32
    return %arg0, %arg1, %c0_i32 : i32, i32, i32
  }
}

module attributes {stable_mosaic.version = 11 : i64} {
  func.func @kernel(%arg0: i32, %arg1: i32, %arg2: memref<1x8x64xbf16, #tpu.memory_space<vmem>>, %arg3: memref<1x8x64xbf16, #tpu.memory_space<vmem>>, %arg4: memref<128x32xbf16, #tpu.memory_space<vmem>>, %arg5: memref<1x32xf32, #tpu.memory_space<vmem>>, %arg6: memref<1x32xf32, #tpu.memory_space<vmem>>, %arg7: memref<1x8x32xbf16, #tpu.memory_space<vmem>>) attributes {dimension_semantics = [#tpu.dimension_semantics<parallel>, #tpu.dimension_semantics<parallel>], iteration_bounds = array<i64: 2, 1>, scalar_prefetch = 0 : i64, scratch_operands = 0 : i64, tpu.core_type = #tpu.core_type<tc>, window_params = [{transform_indices = @transform_0, window_bounds = array<i64: 1, 8, 64>}, {transform_indices = @transform_1, window_bounds = array<i64: 1, 8, 64>}, {pipeline_mode = #tpu.pipeline_mode<synchronous>, transform_indices = @transform_2, window_bounds = array<i64: 128, 32>}, {pipeline_mode = #tpu.pipeline_mode<synchronous>, transform_indices = @transform_3, window_bounds = array<i64: 1, 32>}, {pipeline_mode = #tpu.pipeline_mode<synchronous>, transform_indices = @transform_4, window_bounds = array<i64: 1, 32>}, {transform_indices = @transform_5, window_bounds = array<i64: 1, 8, 32>}]} {
    %c0 = arith.constant 0 : index
    %c0_0 = arith.constant 0 : index
    %c0_1 = arith.constant 0 : index
    %0 = vector.load %arg2[%c0, %c0_0, %c0_1] : memref<1x8x64xbf16, #tpu.memory_space<vmem>>, vector<1x8x64xbf16>
    %1 = vector.shape_cast %0 : vector<1x8x64xbf16> to vector<8x64xbf16>
    %2 = arith.extf %1 : vector<8x64xbf16> to vector<8x64xf32>
    %c0_2 = arith.constant 0 : index
    %c0_3 = arith.constant 0 : index
    %c0_4 = arith.constant 0 : index
    %3 = vector.load %arg3[%c0_2, %c0_3, %c0_4] : memref<1x8x64xbf16, #tpu.memory_space<vmem>>, vector<1x8x64xbf16>
    %4 = vector.shape_cast %3 : vector<1x8x64xbf16> to vector<8x64xbf16>
    %5 = arith.extf %4 : vector<8x64xbf16> to vector<8x64xf32>
    %6 = tpu.concatenate %2, %5 in 0 : vector<8x64xf32>, vector<8x64xf32> -> vector<16x64xf32>
    %7 = vector.extract_strided_slice %6 {offsets = [0, 0], sizes = [8, 64], strides = [1, 1]} : vector<16x64xf32> to vector<8x64xf32>
    %8 = vector.extract_strided_slice %6 {offsets = [1, 0], sizes = [8, 64], strides = [1, 1]} : vector<16x64xf32> to vector<8x64xf32>
    %9 = tpu.concatenate %7, %8 in 1 : vector<8x64xf32>, vector<8x64xf32> -> vector<8x128xf32>
    %10 = arith.truncf %9 : vector<8x128xf32> to vector<8x128xbf16>
    %c0_5 = arith.constant 0 : index
    %c0_6 = arith.constant 0 : index
    %11 = vector.load %arg4[%c0_5, %c0_6] : memref<128x32xbf16, #tpu.memory_space<vmem>>, vector<128x32xbf16>
    %cst = arith.constant dense<0.000000e+00> : vector<8x32xf32>
    %12 = tpu.matmul %10, %11, %cst {dimension_numbers = #tpu.dot_dimension_numbers<[1], [0], [0], [1], [0, 0, 1, 1], [], []>} : vector<8x128xbf16>, vector<128x32xbf16>, vector<8x32xf32> -> vector<8x32xf32>
    %c0_7 = arith.constant 0 : index
    %c0_8 = arith.constant 0 : index
    %13 = vector.load %arg5[%c0_7, %c0_8] : memref<1x32xf32, #tpu.memory_space<vmem>>, vector<1x32xf32>
    %14 = vector.broadcast %13 : vector<1x32xf32> to vector<8x32xf32>
    %15 = arith.mulf %12, %14 : vector<8x32xf32>
    %c0_9 = arith.constant 0 : index
    %c0_10 = arith.constant 0 : index
    %16 = vector.load %arg6[%c0_9, %c0_10] : memref<1x32xf32, #tpu.memory_space<vmem>>, vector<1x32xf32>
    %17 = vector.broadcast %16 : vector<1x32xf32> to vector<8x32xf32>
    %18 = arith.addf %15, %17 : vector<8x32xf32>
    %cst_11 = arith.constant 0.000000e+00 : f32
    %19 = vector.broadcast %cst_11 : f32 to vector<8x32xf32>
    %20 = arith.cmpf ogt, %18, %19 : vector<8x32xf32>
    %cst_12 = arith.constant 2.000000e-01 : f32
    %21 = vector.broadcast %cst_12 : f32 to vector<8x32xf32>
    %22 = arith.mulf %21, %18 : vector<8x32xf32>
    %23 = arith.select %20, %18, %22 : vector<8x32xi1>, vector<8x32xf32>
    %24 = arith.truncf %23 : vector<8x32xf32> to vector<8x32xbf16>
    %c0_13 = arith.constant 0 : index
    %c0_14 = arith.constant 0 : index
    %c0_15 = arith.constant 0 : index
    %25 = vector.load %arg7[%c0_13, %c0_14, %c0_15] : memref<1x8x32xbf16, #tpu.memory_space<vmem>>, vector<1x8x32xbf16>
    %26 = vector.shape_cast %25 : vector<1x8x32xbf16> to vector<8x32xbf16>
    %27 = vector.shape_cast %24 : vector<8x32xbf16> to vector<1x8x32xbf16>
    tpu.vector_store %arg7[%c0_13, %c0_14, %c0_15], %27 {strides = array<i32>} : memref<1x8x32xbf16, #tpu.memory_space<vmem>>, vector<1x8x32xbf16>,
    return
  }
  func.func @transform_0(%arg0: i32, %arg1: i32) -> (i32, i32, i32) {
    %c0_i32 = arith.constant 0 : i32
    %c0_i32_0 = arith.constant 0 : i32
    return %arg0, %arg1, %c0_i32 : i32, i32, i32
  }
  func.func @transform_1(%arg0: i32, %arg1: i32) -> (i32, i32, i32) {
    %c1_i32 = arith.constant 1 : i32
    %0 = arith.addi %arg1, %c1_i32 : i32
    %c1_i32_0 = arith.constant 1 : i32
    %1 = arith.muli %0, %c1_i32_0 : i32
    %c0_i32 = arith.constant 0 : i32
    %c0_i32_1 = arith.constant 0 : i32
    return %arg0, %1, %c0_i32 : i32, i32, i32
  }
  func.func @transform_2(%arg0: i32, %arg1: i32) -> (i32, i32) {
    %c0_i32 = arith.constant 0 : i32
    %c0_i32_0 = arith.constant 0 : i32
    %c0_i32_1 = arith.constant 0 : i32
    return %c0_i32, %c0_i32_0 : i32, i32
  }
  func.func @transform_3(%arg0: i32, %arg1: i32) -> (i32, i32) {
    %c0_i32 = arith.constant 0 : i32
    %c0_i32_0 = arith.constant 0 : i32
    %c0_i32_1 = arith.constant 0 : i32
    return %c0_i32, %c0_i32_0 : i32, i32
  }
  func.func @transform_4(%arg0: i32, %arg1: i32) -> (i32, i32) {
    %c0_i32 = arith.constant 0 : i32
    %c0_i32_0 = arith.constant 0 : i32
    %c0_i32_1 = arith.constant 0 : i32
    return %c0_i32, %c0_i32_0 : i32, i32
  }
  func.func @transform_5(%arg0: i32, %arg1: i32) -> (i32, i32, i32) {
    %c0_i32 = arith.constant 0 : i32
    %c0_i32_0 = arith.constant 0 : i32
    return %arg0, %arg1, %c0_i32 : i32, i32, i32
  }
}

module attributes {stable_mosaic.version = 11 : i64} {
  func.func @kernel(%arg0: i32, %arg1: i32, %arg2: memref<1x8x32xbf16, #tpu.memory_space<vmem>>, %arg3: memref<1x8x32xbf16, #tpu.memory_space<vmem>>, %arg4: memref<96x32xbf16, #tpu.memory_space<vmem>>, %arg5: memref<1x32xf32, #tpu.memory_space<vmem>>, %arg6: memref<1x32xf32, #tpu.memory_space<vmem>>, %arg7: memref<96x32xbf16, #tpu.memory_space<vmem>>, %arg8: memref<1x32xf32, #tpu.memory_space<vmem>>, %arg9: memref<1x32xf32, #tpu.memory_space<vmem>>, %arg10: memref<1x8x32xbf16, #tpu.memory_space<vmem>>) attributes {dimension_semantics = [#tpu.dimension_semantics<parallel>, #tpu.dimension_semantics<parallel>], iteration_bounds = array<i64: 2, 1>, scalar_prefetch = 0 : i64, scratch_operands = 0 : i64, tpu.core_type = #tpu.core_type<tc>, window_params = [{transform_indices = @transform_0, window_bounds = array<i64: 1, 8, 32>}, {transform_indices = @transform_1, window_bounds = array<i64: 1, 8, 32>}, {pipeline_mode = #tpu.pipeline_mode<synchronous>, transform_indices = @transform_2, window_bounds = array<i64: 96, 32>}, {pipeline_mode = #tpu.pipeline_mode<synchronous>, transform_indices = @transform_3, window_bounds = array<i64: 1, 32>}, {pipeline_mode = #tpu.pipeline_mode<synchronous>, transform_indices = @transform_4, window_bounds = array<i64: 1, 32>}, {pipeline_mode = #tpu.pipeline_mode<synchronous>, transform_indices = @transform_5, window_bounds = array<i64: 96, 32>}, {pipeline_mode = #tpu.pipeline_mode<synchronous>, transform_indices = @transform_6, window_bounds = array<i64: 1, 32>}, {pipeline_mode = #tpu.pipeline_mode<synchronous>, transform_indices = @transform_7, window_bounds = array<i64: 1, 32>}, {transform_indices = @transform_8, window_bounds = array<i64: 1, 8, 32>}]} {
    %c0 = arith.constant 0 : index
    %c0_0 = arith.constant 0 : index
    %c0_1 = arith.constant 0 : index
    %0 = vector.load %arg2[%c0, %c0_0, %c0_1] : memref<1x8x32xbf16, #tpu.memory_space<vmem>>, vector<1x8x32xbf16>
    %1 = vector.shape_cast %0 : vector<1x8x32xbf16> to vector<8x32xbf16>
    %2 = arith.extf %1 : vector<8x32xbf16> to vector<8x32xf32>
    %c0_2 = arith.constant 0 : index
    %c0_3 = arith.constant 0 : index
    %c0_4 = arith.constant 0 : index
    %3 = vector.load %arg3[%c0_2, %c0_3, %c0_4] : memref<1x8x32xbf16, #tpu.memory_space<vmem>>, vector<1x8x32xbf16>
    %4 = vector.shape_cast %3 : vector<1x8x32xbf16> to vector<8x32xbf16>
    %5 = arith.extf %4 : vector<8x32xbf16> to vector<8x32xf32>
    %6 = tpu.concatenate %2, %5 in 0 : vector<8x32xf32>, vector<8x32xf32> -> vector<16x32xf32>
    %7 = vector.extract_strided_slice %6 {offsets = [0, 0], sizes = [10, 32], strides = [1, 1]} : vector<16x32xf32> to vector<10x32xf32>
    %8 = vector.extract_strided_slice %6 {offsets = [1, 0], sizes = [10, 32], strides = [1, 1]} : vector<16x32xf32> to vector<10x32xf32>
    %9 = vector.extract_strided_slice %6 {offsets = [2, 0], sizes = [10, 32], strides = [1, 1]} : vector<16x32xf32> to vector<10x32xf32>
    %10 = tpu.concatenate %7, %8, %9 in 1 : vector<10x32xf32>, vector<10x32xf32>, vector<10x32xf32> -> vector<10x96xf32>
    %11 = arith.truncf %10 : vector<10x96xf32> to vector<10x96xbf16>
    %c0_5 = arith.constant 0 : index
    %c0_6 = arith.constant 0 : index
    %12 = vector.load %arg4[%c0_5, %c0_6] : memref<96x32xbf16, #tpu.memory_space<vmem>>, vector<96x32xbf16>
    %cst = arith.constant dense<0.000000e+00> : vector<10x32xf32>
    %13 = tpu.matmul %11, %12, %cst {dimension_numbers = #tpu.dot_dimension_numbers<[1], [0], [0], [1], [0, 0, 1, 1], [], []>} : vector<10x96xbf16>, vector<96x32xbf16>, vector<10x32xf32> -> vector<10x32xf32>
    %c0_7 = arith.constant 0 : index
    %c0_8 = arith.constant 0 : index
    %14 = vector.load %arg5[%c0_7, %c0_8] : memref<1x32xf32, #tpu.memory_space<vmem>>, vector<1x32xf32>
    %15 = vector.broadcast %14 : vector<1x32xf32> to vector<10x32xf32>
    %16 = arith.mulf %13, %15 : vector<10x32xf32>
    %c0_9 = arith.constant 0 : index
    %c0_10 = arith.constant 0 : index
    %17 = vector.load %arg6[%c0_9, %c0_10] : memref<1x32xf32, #tpu.memory_space<vmem>>, vector<1x32xf32>
    %18 = vector.broadcast %17 : vector<1x32xf32> to vector<10x32xf32>
    %19 = arith.addf %16, %18 : vector<10x32xf32>
    %cst_11 = arith.constant 0.000000e+00 : f32
    %20 = vector.broadcast %cst_11 : f32 to vector<10x32xf32>
    %21 = arith.cmpf ogt, %19, %20 : vector<10x32xf32>
    %cst_12 = arith.constant 2.000000e-01 : f32
    %22 = vector.broadcast %cst_12 : f32 to vector<10x32xf32>
    %23 = arith.mulf %22, %19 : vector<10x32xf32>
    %24 = arith.select %21, %19, %23 : vector<10x32xi1>, vector<10x32xf32>
    %25 = vector.extract_strided_slice %24 {offsets = [0, 0], sizes = [8, 32], strides = [1, 1]} : vector<10x32xf32> to vector<8x32xf32>
    %26 = vector.extract_strided_slice %24 {offsets = [1, 0], sizes = [8, 32], strides = [1, 1]} : vector<10x32xf32> to vector<8x32xf32>
    %27 = vector.extract_strided_slice %24 {offsets = [2, 0], sizes = [8, 32], strides = [1, 1]} : vector<10x32xf32> to vector<8x32xf32>
    %28 = tpu.concatenate %25, %26, %27 in 1 : vector<8x32xf32>, vector<8x32xf32>, vector<8x32xf32> -> vector<8x96xf32>
    %29 = arith.truncf %28 : vector<8x96xf32> to vector<8x96xbf16>
    %c0_13 = arith.constant 0 : index
    %c0_14 = arith.constant 0 : index
    %30 = vector.load %arg7[%c0_13, %c0_14] : memref<96x32xbf16, #tpu.memory_space<vmem>>, vector<96x32xbf16>
    %cst_15 = arith.constant dense<0.000000e+00> : vector<8x32xf32>
    %31 = tpu.matmul %29, %30, %cst_15 {dimension_numbers = #tpu.dot_dimension_numbers<[1], [0], [0], [1], [0, 0, 1, 1], [], []>} : vector<8x96xbf16>, vector<96x32xbf16>, vector<8x32xf32> -> vector<8x32xf32>
    %c0_16 = arith.constant 0 : index
    %c0_17 = arith.constant 0 : index
    %32 = vector.load %arg8[%c0_16, %c0_17] : memref<1x32xf32, #tpu.memory_space<vmem>>, vector<1x32xf32>
    %33 = vector.broadcast %32 : vector<1x32xf32> to vector<8x32xf32>
    %34 = arith.mulf %31, %33 : vector<8x32xf32>
    %c0_18 = arith.constant 0 : index
    %c0_19 = arith.constant 0 : index
    %35 = vector.load %arg9[%c0_18, %c0_19] : memref<1x32xf32, #tpu.memory_space<vmem>>, vector<1x32xf32>
    %36 = vector.broadcast %35 : vector<1x32xf32> to vector<8x32xf32>
    %37 = arith.addf %34, %36 : vector<8x32xf32>
    %38 = vector.extract_strided_slice %6 {offsets = [2, 0], sizes = [8, 32], strides = [1, 1]} : vector<16x32xf32> to vector<8x32xf32>
    %39 = arith.addf %37, %38 : vector<8x32xf32>
    %cst_20 = arith.constant 0.000000e+00 : f32
    %40 = vector.broadcast %cst_20 : f32 to vector<8x32xf32>
    %41 = arith.cmpf ogt, %39, %40 : vector<8x32xf32>
    %cst_21 = arith.constant 2.000000e-01 : f32
    %42 = vector.broadcast %cst_21 : f32 to vector<8x32xf32>
    %43 = arith.mulf %42, %39 : vector<8x32xf32>
    %44 = arith.select %41, %39, %43 : vector<8x32xi1>, vector<8x32xf32>
    %45 = arith.truncf %44 : vector<8x32xf32> to vector<8x32xbf16>
    %c0_22 = arith.constant 0 : index
    %c0_23 = arith.constant 0 : index
    %c0_24 = arith.constant 0 : index
    %46 = vector.load %arg10[%c0_22, %c0_23, %c0_24] : memref<1x8x32xbf16, #tpu.memory_space<vmem>>, vector<1x8x32xbf16>
    %47 = vector.shape_cast %46 : vector<1x8x32xbf16> to vector<8x32xbf16>
    %48 = vector.shape_cast %45 : vector<8x32xbf16> to vector<1x8x32xbf16>
    tpu.vector_store %arg10[%c0_22, %c0_23, %c0_24], %48 {strides = array<i32>} : memref<1x8x32xbf16, #tpu.memory_space<vmem>>, vector<1x8x32xbf16>,
    return
  }
  func.func @transform_0(%arg0: i32, %arg1: i32) -> (i32, i32, i32) {
    %c0_i32 = arith.constant 0 : i32
    %c0_i32_0 = arith.constant 0 : i32
    return %arg0, %arg1, %c0_i32 : i32, i32, i32
  }
  func.func @transform_1(%arg0: i32, %arg1: i32) -> (i32, i32, i32) {
    %c1_i32 = arith.constant 1 : i32
    %0 = arith.addi %arg1, %c1_i32 : i32
    %c1_i32_0 = arith.constant 1 : i32
    %1 = arith.muli %0, %c1_i32_0 : i32
    %c0_i32 = arith.constant 0 : i32
    %c0_i32_1 = arith.constant 0 : i32
    return %arg0, %1, %c0_i32 : i32, i32, i32
  }
  func.func @transform_2(%arg0: i32, %arg1: i32) -> (i32, i32) {
    %c0_i32 = arith.constant 0 : i32
    %c0_i32_0 = arith.constant 0 : i32
    %c0_i32_1 = arith.constant 0 : i32
    return %c0_i32, %c0_i32_0 : i32, i32
  }
  func.func @transform_3(%arg0: i32, %arg1: i32) -> (i32, i32) {
    %c0_i32 = arith.constant 0 : i32
    %c0_i32_0 = arith.constant 0 : i32
    %c0_i32_1 = arith.constant 0 : i32
    return %c0_i32, %c0_i32_0 : i32, i32
  }
  func.func @transform_4(%arg0: i32, %arg1: i32) -> (i32, i32) {
    %c0_i32 = arith.constant 0 : i32
    %c0_i32_0 = arith.constant 0 : i32
    %c0_i32_1 = arith.constant 0 : i32
    return %c0_i32, %c0_i32_0 : i32, i32
  }
  func.func @transform_5(%arg0: i32, %arg1: i32) -> (i32, i32) {
    %c0_i32 = arith.constant 0 : i32
    %c0_i32_0 = arith.constant 0 : i32
    %c0_i32_1 = arith.constant 0 : i32
    return %c0_i32, %c0_i32_0 : i32, i32
  }
  func.func @transform_6(%arg0: i32, %arg1: i32) -> (i32, i32) {
    %c0_i32 = arith.constant 0 : i32
    %c0_i32_0 = arith.constant 0 : i32
    %c0_i32_1 = arith.constant 0 : i32
    return %c0_i32, %c0_i32_0 : i32, i32
  }
  func.func @transform_7(%arg0: i32, %arg1: i32) -> (i32, i32) {
    %c0_i32 = arith.constant 0 : i32
    %c0_i32_0 = arith.constant 0 : i32
    %c0_i32_1 = arith.constant 0 : i32
    return %c0_i32, %c0_i32_0 : i32, i32
  }
  func.func @transform_8(%arg0: i32, %arg1: i32) -> (i32, i32, i32) {
    %c0_i32 = arith.constant 0 : i32
    %c0_i32_0 = arith.constant 0 : i32
    return %arg0, %arg1, %c0_i32 : i32, i32, i32
  }
}

module attributes {stable_mosaic.version = 11 : i64} {
  func.func @kernel(%arg0: i32, %arg1: i32, %arg2: memref<1x8x32xbf16, #tpu.memory_space<vmem>>, %arg3: memref<1x8x32xbf16, #tpu.memory_space<vmem>>, %arg4: memref<96x32xbf16, #tpu.memory_space<vmem>>, %arg5: memref<1x32xf32, #tpu.memory_space<vmem>>, %arg6: memref<1x32xf32, #tpu.memory_space<vmem>>, %arg7: memref<1x8x32xf32, #tpu.memory_space<vmem>>) attributes {dimension_semantics = [#tpu.dimension_semantics<parallel>, #tpu.dimension_semantics<parallel>], iteration_bounds = array<i64: 2, 1>, scalar_prefetch = 0 : i64, scratch_operands = 0 : i64, tpu.core_type = #tpu.core_type<tc>, window_params = [{transform_indices = @transform_0, window_bounds = array<i64: 1, 8, 32>}, {transform_indices = @transform_1, window_bounds = array<i64: 1, 8, 32>}, {pipeline_mode = #tpu.pipeline_mode<synchronous>, transform_indices = @transform_2, window_bounds = array<i64: 96, 32>}, {pipeline_mode = #tpu.pipeline_mode<synchronous>, transform_indices = @transform_3, window_bounds = array<i64: 1, 32>}, {pipeline_mode = #tpu.pipeline_mode<synchronous>, transform_indices = @transform_4, window_bounds = array<i64: 1, 32>}, {transform_indices = @transform_5, window_bounds = array<i64: 1, 8, 32>}]} {
    %c0 = arith.constant 0 : index
    %c0_0 = arith.constant 0 : index
    %c0_1 = arith.constant 0 : index
    %0 = vector.load %arg2[%c0, %c0_0, %c0_1] : memref<1x8x32xbf16, #tpu.memory_space<vmem>>, vector<1x8x32xbf16>
    %1 = vector.shape_cast %0 : vector<1x8x32xbf16> to vector<8x32xbf16>
    %2 = arith.extf %1 : vector<8x32xbf16> to vector<8x32xf32>
    %c0_2 = arith.constant 0 : index
    %c0_3 = arith.constant 0 : index
    %c0_4 = arith.constant 0 : index
    %3 = vector.load %arg3[%c0_2, %c0_3, %c0_4] : memref<1x8x32xbf16, #tpu.memory_space<vmem>>, vector<1x8x32xbf16>
    %4 = vector.shape_cast %3 : vector<1x8x32xbf16> to vector<8x32xbf16>
    %5 = arith.extf %4 : vector<8x32xbf16> to vector<8x32xf32>
    %6 = tpu.concatenate %2, %5 in 0 : vector<8x32xf32>, vector<8x32xf32> -> vector<16x32xf32>
    %7 = vector.extract_strided_slice %6 {offsets = [0, 0], sizes = [8, 32], strides = [1, 1]} : vector<16x32xf32> to vector<8x32xf32>
    %8 = vector.extract_strided_slice %6 {offsets = [1, 0], sizes = [8, 32], strides = [1, 1]} : vector<16x32xf32> to vector<8x32xf32>
    %9 = vector.extract_strided_slice %6 {offsets = [2, 0], sizes = [8, 32], strides = [1, 1]} : vector<16x32xf32> to vector<8x32xf32>
    %10 = tpu.concatenate %7, %8, %9 in 1 : vector<8x32xf32>, vector<8x32xf32>, vector<8x32xf32> -> vector<8x96xf32>
    %11 = arith.truncf %10 : vector<8x96xf32> to vector<8x96xbf16>
    %c0_5 = arith.constant 0 : index
    %c0_6 = arith.constant 0 : index
    %12 = vector.load %arg4[%c0_5, %c0_6] : memref<96x32xbf16, #tpu.memory_space<vmem>>, vector<96x32xbf16>
    %cst = arith.constant dense<0.000000e+00> : vector<8x32xf32>
    %13 = tpu.matmul %11, %12, %cst {dimension_numbers = #tpu.dot_dimension_numbers<[1], [0], [0], [1], [0, 0, 1, 1], [], []>} : vector<8x96xbf16>, vector<96x32xbf16>, vector<8x32xf32> -> vector<8x32xf32>
    %c0_7 = arith.constant 0 : index
    %c0_8 = arith.constant 0 : index
    %14 = vector.load %arg5[%c0_7, %c0_8] : memref<1x32xf32, #tpu.memory_space<vmem>>, vector<1x32xf32>
    %15 = vector.broadcast %14 : vector<1x32xf32> to vector<8x32xf32>
    %16 = arith.mulf %13, %15 : vector<8x32xf32>
    %c0_9 = arith.constant 0 : index
    %c0_10 = arith.constant 0 : index
    %17 = vector.load %arg6[%c0_9, %c0_10] : memref<1x32xf32, #tpu.memory_space<vmem>>, vector<1x32xf32>
    %18 = vector.broadcast %17 : vector<1x32xf32> to vector<8x32xf32>
    %19 = arith.addf %16, %18 : vector<8x32xf32>
    %cst_11 = arith.constant 0.000000e+00 : f32
    %20 = vector.broadcast %cst_11 : f32 to vector<8x32xf32>
    %21 = arith.cmpf ogt, %19, %20 : vector<8x32xf32>
    %cst_12 = arith.constant 2.000000e-01 : f32
    %22 = vector.broadcast %cst_12 : f32 to vector<8x32xf32>
    %23 = arith.mulf %22, %19 : vector<8x32xf32>
    %24 = arith.select %21, %19, %23 : vector<8x32xi1>, vector<8x32xf32>
    %c0_13 = arith.constant 0 : index
    %c0_14 = arith.constant 0 : index
    %c0_15 = arith.constant 0 : index
    %25 = vector.load %arg7[%c0_13, %c0_14, %c0_15] : memref<1x8x32xf32, #tpu.memory_space<vmem>>, vector<1x8x32xf32>
    %26 = vector.shape_cast %25 : vector<1x8x32xf32> to vector<8x32xf32>
    %27 = vector.shape_cast %24 : vector<8x32xf32> to vector<1x8x32xf32>
    tpu.vector_store %arg7[%c0_13, %c0_14, %c0_15], %27 {strides = array<i32>} : memref<1x8x32xf32, #tpu.memory_space<vmem>>, vector<1x8x32xf32>,
    return
  }
  func.func @transform_0(%arg0: i32, %arg1: i32) -> (i32, i32, i32) {
    %c0_i32 = arith.constant 0 : i32
    %c0_i32_0 = arith.constant 0 : i32
    return %arg0, %arg1, %c0_i32 : i32, i32, i32
  }
  func.func @transform_1(%arg0: i32, %arg1: i32) -> (i32, i32, i32) {
    %c1_i32 = arith.constant 1 : i32
    %0 = arith.addi %arg1, %c1_i32 : i32
    %c1_i32_0 = arith.constant 1 : i32
    %1 = arith.muli %0, %c1_i32_0 : i32
    %c0_i32 = arith.constant 0 : i32
    %c0_i32_1 = arith.constant 0 : i32
    return %arg0, %1, %c0_i32 : i32, i32, i32
  }
  func.func @transform_2(%arg0: i32, %arg1: i32) -> (i32, i32) {
    %c0_i32 = arith.constant 0 : i32
    %c0_i32_0 = arith.constant 0 : i32
    %c0_i32_1 = arith.constant 0 : i32
    return %c0_i32, %c0_i32_0 : i32, i32
  }
  func.func @transform_3(%arg0: i32, %arg1: i32) -> (i32, i32) {
    %c0_i32 = arith.constant 0 : i32
    %c0_i32_0 = arith.constant 0 : i32
    %c0_i32_1 = arith.constant 0 : i32
    return %c0_i32, %c0_i32_0 : i32, i32
  }
  func.func @transform_4(%arg0: i32, %arg1: i32) -> (i32, i32) {
    %c0_i32 = arith.constant 0 : i32
    %c0_i32_0 = arith.constant 0 : i32
    %c0_i32_1 = arith.constant 0 : i32
    return %c0_i32, %c0_i32_0 : i32, i32
  }
  func.func @transform_5(%arg0: i32, %arg1: i32) -> (i32, i32, i32) {
    %c0_i32 = arith.constant 0 : i32
    %c0_i32_0 = arith.constant 0 : i32
    return %arg0, %arg1, %c0_i32 : i32, i32, i32
  }
}

module attributes {stable_mosaic.version = 11 : i64} {
  func.func @kernel(%arg0: i32, %arg1: i32, %arg2: memref<1x8x32xbf16, #tpu.memory_space<vmem>>, %arg3: memref<1x8x32xbf16, #tpu.memory_space<vmem>>, %arg4: memref<96x32xbf16, #tpu.memory_space<vmem>>, %arg5: memref<1x32xf32, #tpu.memory_space<vmem>>, %arg6: memref<1x32xf32, #tpu.memory_space<vmem>>, %arg7: memref<96x32xbf16, #tpu.memory_space<vmem>>, %arg8: memref<1x32xf32, #tpu.memory_space<vmem>>, %arg9: memref<1x32xf32, #tpu.memory_space<vmem>>, %arg10: memref<1x8x32xbf16, #tpu.memory_space<vmem>>) attributes {dimension_semantics = [#tpu.dimension_semantics<parallel>, #tpu.dimension_semantics<parallel>], iteration_bounds = array<i64: 2, 1>, scalar_prefetch = 0 : i64, scratch_operands = 0 : i64, tpu.core_type = #tpu.core_type<tc>, window_params = [{transform_indices = @transform_0, window_bounds = array<i64: 1, 8, 32>}, {transform_indices = @transform_1, window_bounds = array<i64: 1, 8, 32>}, {pipeline_mode = #tpu.pipeline_mode<synchronous>, transform_indices = @transform_2, window_bounds = array<i64: 96, 32>}, {pipeline_mode = #tpu.pipeline_mode<synchronous>, transform_indices = @transform_3, window_bounds = array<i64: 1, 32>}, {pipeline_mode = #tpu.pipeline_mode<synchronous>, transform_indices = @transform_4, window_bounds = array<i64: 1, 32>}, {pipeline_mode = #tpu.pipeline_mode<synchronous>, transform_indices = @transform_5, window_bounds = array<i64: 96, 32>}, {pipeline_mode = #tpu.pipeline_mode<synchronous>, transform_indices = @transform_6, window_bounds = array<i64: 1, 32>}, {pipeline_mode = #tpu.pipeline_mode<synchronous>, transform_indices = @transform_7, window_bounds = array<i64: 1, 32>}, {transform_indices = @transform_8, window_bounds = array<i64: 1, 8, 32>}]} {
    %c0 = arith.constant 0 : index
    %c0_0 = arith.constant 0 : index
    %c0_1 = arith.constant 0 : index
    %0 = vector.load %arg2[%c0, %c0_0, %c0_1] : memref<1x8x32xbf16, #tpu.memory_space<vmem>>, vector<1x8x32xbf16>
    %1 = vector.shape_cast %0 : vector<1x8x32xbf16> to vector<8x32xbf16>
    %2 = arith.extf %1 : vector<8x32xbf16> to vector<8x32xf32>
    %c0_2 = arith.constant 0 : index
    %c0_3 = arith.constant 0 : index
    %c0_4 = arith.constant 0 : index
    %3 = vector.load %arg3[%c0_2, %c0_3, %c0_4] : memref<1x8x32xbf16, #tpu.memory_space<vmem>>, vector<1x8x32xbf16>
    %4 = vector.shape_cast %3 : vector<1x8x32xbf16> to vector<8x32xbf16>
    %5 = arith.extf %4 : vector<8x32xbf16> to vector<8x32xf32>
    %6 = tpu.concatenate %2, %5 in 0 : vector<8x32xf32>, vector<8x32xf32> -> vector<16x32xf32>
    %7 = vector.extract_strided_slice %6 {offsets = [0, 0], sizes = [12, 32], strides = [1, 1]} : vector<16x32xf32> to vector<12x32xf32>
    %8 = vector.extract_strided_slice %6 {offsets = [2, 0], sizes = [12, 32], strides = [1, 1]} : vector<16x32xf32> to vector<12x32xf32>
    %9 = vector.extract_strided_slice %6 {offsets = [4, 0], sizes = [12, 32], strides = [1, 1]} : vector<16x32xf32> to vector<12x32xf32>
    %10 = tpu.concatenate %7, %8, %9 in 1 : vector<12x32xf32>, vector<12x32xf32>, vector<12x32xf32> -> vector<12x96xf32>
    %11 = arith.truncf %10 : vector<12x96xf32> to vector<12x96xbf16>
    %c0_5 = arith.constant 0 : index
    %c0_6 = arith.constant 0 : index
    %12 = vector.load %arg4[%c0_5, %c0_6] : memref<96x32xbf16, #tpu.memory_space<vmem>>, vector<96x32xbf16>
    %cst = arith.constant dense<0.000000e+00> : vector<12x32xf32>
    %13 = tpu.matmul %11, %12, %cst {dimension_numbers = #tpu.dot_dimension_numbers<[1], [0], [0], [1], [0, 0, 1, 1], [], []>} : vector<12x96xbf16>, vector<96x32xbf16>, vector<12x32xf32> -> vector<12x32xf32>
    %c0_7 = arith.constant 0 : index
    %c0_8 = arith.constant 0 : index
    %14 = vector.load %arg5[%c0_7, %c0_8] : memref<1x32xf32, #tpu.memory_space<vmem>>, vector<1x32xf32>
    %15 = vector.broadcast %14 : vector<1x32xf32> to vector<12x32xf32>
    %16 = arith.mulf %13, %15 : vector<12x32xf32>
    %c0_9 = arith.constant 0 : index
    %c0_10 = arith.constant 0 : index
    %17 = vector.load %arg6[%c0_9, %c0_10] : memref<1x32xf32, #tpu.memory_space<vmem>>, vector<1x32xf32>
    %18 = vector.broadcast %17 : vector<1x32xf32> to vector<12x32xf32>
    %19 = arith.addf %16, %18 : vector<12x32xf32>
    %cst_11 = arith.constant 0.000000e+00 : f32
    %20 = vector.broadcast %cst_11 : f32 to vector<12x32xf32>
    %21 = arith.cmpf ogt, %19, %20 : vector<12x32xf32>
    %cst_12 = arith.constant 2.000000e-01 : f32
    %22 = vector.broadcast %cst_12 : f32 to vector<12x32xf32>
    %23 = arith.mulf %22, %19 : vector<12x32xf32>
    %24 = arith.select %21, %19, %23 : vector<12x32xi1>, vector<12x32xf32>
    %25 = vector.extract_strided_slice %24 {offsets = [0, 0], sizes = [8, 32], strides = [1, 1]} : vector<12x32xf32> to vector<8x32xf32>
    %26 = vector.extract_strided_slice %24 {offsets = [2, 0], sizes = [8, 32], strides = [1, 1]} : vector<12x32xf32> to vector<8x32xf32>
    %27 = vector.extract_strided_slice %24 {offsets = [4, 0], sizes = [8, 32], strides = [1, 1]} : vector<12x32xf32> to vector<8x32xf32>
    %28 = tpu.concatenate %25, %26, %27 in 1 : vector<8x32xf32>, vector<8x32xf32>, vector<8x32xf32> -> vector<8x96xf32>
    %29 = arith.truncf %28 : vector<8x96xf32> to vector<8x96xbf16>
    %c0_13 = arith.constant 0 : index
    %c0_14 = arith.constant 0 : index
    %30 = vector.load %arg7[%c0_13, %c0_14] : memref<96x32xbf16, #tpu.memory_space<vmem>>, vector<96x32xbf16>
    %cst_15 = arith.constant dense<0.000000e+00> : vector<8x32xf32>
    %31 = tpu.matmul %29, %30, %cst_15 {dimension_numbers = #tpu.dot_dimension_numbers<[1], [0], [0], [1], [0, 0, 1, 1], [], []>} : vector<8x96xbf16>, vector<96x32xbf16>, vector<8x32xf32> -> vector<8x32xf32>
    %c0_16 = arith.constant 0 : index
    %c0_17 = arith.constant 0 : index
    %32 = vector.load %arg8[%c0_16, %c0_17] : memref<1x32xf32, #tpu.memory_space<vmem>>, vector<1x32xf32>
    %33 = vector.broadcast %32 : vector<1x32xf32> to vector<8x32xf32>
    %34 = arith.mulf %31, %33 : vector<8x32xf32>
    %c0_18 = arith.constant 0 : index
    %c0_19 = arith.constant 0 : index
    %35 = vector.load %arg9[%c0_18, %c0_19] : memref<1x32xf32, #tpu.memory_space<vmem>>, vector<1x32xf32>
    %36 = vector.broadcast %35 : vector<1x32xf32> to vector<8x32xf32>
    %37 = arith.addf %34, %36 : vector<8x32xf32>
    %38 = vector.extract_strided_slice %6 {offsets = [4, 0], sizes = [8, 32], strides = [1, 1]} : vector<16x32xf32> to vector<8x32xf32>
    %39 = arith.addf %37, %38 : vector<8x32xf32>
    %cst_20 = arith.constant 0.000000e+00 : f32
    %40 = vector.broadcast %cst_20 : f32 to vector<8x32xf32>
    %41 = arith.cmpf ogt, %39, %40 : vector<8x32xf32>
    %cst_21 = arith.constant 2.000000e-01 : f32
    %42 = vector.broadcast %cst_21 : f32 to vector<8x32xf32>
    %43 = arith.mulf %42, %39 : vector<8x32xf32>
    %44 = arith.select %41, %39, %43 : vector<8x32xi1>, vector<8x32xf32>
    %45 = arith.truncf %44 : vector<8x32xf32> to vector<8x32xbf16>
    %c0_22 = arith.constant 0 : index
    %c0_23 = arith.constant 0 : index
    %c0_24 = arith.constant 0 : index
    %46 = vector.load %arg10[%c0_22, %c0_23, %c0_24] : memref<1x8x32xbf16, #tpu.memory_space<vmem>>, vector<1x8x32xbf16>
    %47 = vector.shape_cast %46 : vector<1x8x32xbf16> to vector<8x32xbf16>
    %48 = vector.shape_cast %45 : vector<8x32xbf16> to vector<1x8x32xbf16>
    tpu.vector_store %arg10[%c0_22, %c0_23, %c0_24], %48 {strides = array<i32>} : memref<1x8x32xbf16, #tpu.memory_space<vmem>>, vector<1x8x32xbf16>,
    return
  }
  func.func @transform_0(%arg0: i32, %arg1: i32) -> (i32, i32, i32) {
    %c0_i32 = arith.constant 0 : i32
    %c0_i32_0 = arith.constant 0 : i32
    return %arg0, %arg1, %c0_i32 : i32, i32, i32
  }
  func.func @transform_1(%arg0: i32, %arg1: i32) -> (i32, i32, i32) {
    %c1_i32 = arith.constant 1 : i32
    %0 = arith.addi %arg1, %c1_i32 : i32
    %c1_i32_0 = arith.constant 1 : i32
    %1 = arith.muli %0, %c1_i32_0 : i32
    %c0_i32 = arith.constant 0 : i32
    %c0_i32_1 = arith.constant 0 : i32
    return %arg0, %1, %c0_i32 : i32, i32, i32
  }
  func.func @transform_2(%arg0: i32, %arg1: i32) -> (i32, i32) {
    %c0_i32 = arith.constant 0 : i32
    %c0_i32_0 = arith.constant 0 : i32
    %c0_i32_1 = arith.constant 0 : i32
    return %c0_i32, %c0_i32_0 : i32, i32
  }
  func.func @transform_3(%arg0: i32, %arg1: i32) -> (i32, i32) {
    %c0_i32 = arith.constant 0 : i32
    %c0_i32_0 = arith.constant 0 : i32
    %c0_i32_1 = arith.constant 0 : i32
    return %c0_i32, %c0_i32_0 : i32, i32
  }
  func.func @transform_4(%arg0: i32, %arg1: i32) -> (i32, i32) {
    %c0_i32 = arith.constant 0 : i32
    %c0_i32_0 = arith.constant 0 : i32
    %c0_i32_1 = arith.constant 0 : i32
    return %c0_i32, %c0_i32_0 : i32, i32
  }
  func.func @transform_5(%arg0: i32, %arg1: i32) -> (i32, i32) {
    %c0_i32 = arith.constant 0 : i32
    %c0_i32_0 = arith.constant 0 : i32
    %c0_i32_1 = arith.constant 0 : i32
    return %c0_i32, %c0_i32_0 : i32, i32
  }
  func.func @transform_6(%arg0: i32, %arg1: i32) -> (i32, i32) {
    %c0_i32 = arith.constant 0 : i32
    %c0_i32_0 = arith.constant 0 : i32
    %c0_i32_1 = arith.constant 0 : i32
    return %c0_i32, %c0_i32_0 : i32, i32
  }
  func.func @transform_7(%arg0: i32, %arg1: i32) -> (i32, i32) {
    %c0_i32 = arith.constant 0 : i32
    %c0_i32_0 = arith.constant 0 : i32
    %c0_i32_1 = arith.constant 0 : i32
    return %c0_i32, %c0_i32_0 : i32, i32
  }
  func.func @transform_8(%arg0: i32, %arg1: i32) -> (i32, i32, i32) {
    %c0_i32 = arith.constant 0 : i32
    %c0_i32_0 = arith.constant 0 : i32
    return %arg0, %arg1, %c0_i32 : i32, i32, i32
  }
}

</mosaic_0001>

<bundles_post_ra>
// kernel: encoder_forward.8
= control target key start
LH: loop header
LB: loop body
LE: loop exit
PB: predicated region body
PF: predicated region fallthrough
CT: control target
= control target key end

     0   :  { %s669_s15 = smov 0   ;;  %s671_s16 = smov 0   ;;  %s736_s0 = inlined_call_operand.vmem [shape: bf16[2,64,7], index: 0, kind: input, shape index: {}]   ;;  %s737_s1 = inlined_call_operand.vmem [shape: bf16[7,32], index: 1, kind: input, shape index: {}]   ;;  %s738_s2 = inlined_call_operand.vmem [shape: f32[1,32], index: 2, kind: input, shape index: {}]   ;;  %s739_s3 = inlined_call_operand.vmem [shape: f32[1,32], index: 3, kind: input, shape index: {}]   ;;  %s740_s4 = inlined_call_operand.vmem [shape: bf16[2,64,32], index: 4, kind: output, shape index: {}]  }
   0x1   :  { %s673_s17 = smov 0  }
   0x2 LB: > { %s26_s18 = sadd.s32 1, %s637_s16  ;;  %p538_p0 = scmp.ge.s32.totalorder %s641_s17, 1  ;;  %s641_s17 = sphi %s673_s17, %s14_s17   ;;  %s637_s16 = sphi %s671_s16, %s742_s16   ;;  %s633_s15 = sphi %s669_s15, %s741_s15  }
   0x3   : > { %p28_p1 = scmp.ge.s32.totalorder %s26_s18, 2  ;;  %p183_p2 = scmp.lt.s32.totalorder %s641_s17, 3 }
   0x5   : > { %s744_s18 = smov (%p28_p1, %s26_s18), 0  ;;  %p184_p3 = pnand %p538_p0, %p183_p2 }
   0x6   : > { %p218_p4 = scmp.lt.s32.totalorder (!%p184_p3), %s633_s15, 1 }
   0x7   : > { %187 = sbr.rel (%p184_p3) target bundleno = 234 (0xea), region = 36 }
   0xc   : > { %v246_v0 = vld [vmem:[%s737_s1] sm:$0xf]  ;;  %vm280_vm0 = vcmask 1042432   ;;  %vm281_vm1 = vcmask 1043456   ;;  %v643_v1 = vmov 65535   ;;  %s746_s15 = smov (!%p218_p4, %s633_s15), 1 }
   0xd   : > { %v282_v2 = vsel %vm280_vm0, 4294967295, %v643_v1  ;;  %s563_s21 = sshll.u32 %s746_s15, 5  ;;  %vm267_vm2 = vcmask 56320   ;;  %v551_v9 = vld [vmem:[%s738_s2] ss:$0 sm:$0xff]  ;;  %vm438_vm3 = vcmask 257024  }
   0xe   : > { %v283_v3 = vsel %vm281_vm1, %v282_v2, 0  ;;  %s225_s24 = scalar_lea.vmem %s736_s0, %s563_s21  ;;  %v552_v11 = vld [vmem:[%s739_s3] ss:$0 sm:$0xff]  ;;  %s709_s5 = scalar_lea.vmem %s740_s4, %s563_s21 }
   0xf   : > { %v285_v4 = vand.u32 %v283_v3, %v246_v0  ;;  %v615_v5 = vld [vmem:[%s225_s24] sm:$0xff]   ;;  %v616_v6 = vld [vmem:[%s225_s24 + $0x10] sm:$0xff]   ;;  %v617_v7 = vld [vmem:[%s225_s24 + $0x8] sm:$0xff]  }
  0x10   : > { %580 = vmatprep.mubr.msk.bf16.mxu0 %vm267_vm2, %v615_v5  ;;  %584 = vmatprep.mubr.msk.bf16.mxu1 %vm267_vm2, %v616_v6  ;;  %v618_v8 = vld [vmem:[%s225_s24 + $0x18] sm:$0xff]  }
  0x11   : > { %578 = vmatprep.subr.bf16.mxu0 %v285_v4  ;;  %588 = vmatprep.subr.bf16.mxu1 %v285_v4 }
  0x12   : > { %579 = vmatpush3.bf16.msra.mxu0 %v285_v4  ;;  %589 = vmatpush3.bf16.msra.mxu1 %v285_v4 }
  0x15   : > { %581 = vmatmul.mubr.msk.bf16.vlgmr.msra.gmra.mxu0 %vm267_vm2, %v617_v7  ;;  %585 = vmatmul.mubr.msk.bf16.vlgmr.msra.gmra.mxu1 %vm267_vm2, %v618_v8 }
  0xd5   : > { %v582_v10 = vpop.f32.mrf.mxu0  ;;  %v586_v13 = vpop.f32.mrf.mxu1 }
  0xd6   : > { %v361_v12 = vmul.f32 %v582_v10, %v551_v9  ;;  %v365_v14 = vmul.f32 %v586_v13, %v551_v9 }
  0xd7   : > { %v321_v15 = vpop.f32.mrf.mxu0  ;;  %v337_v18 = vpop.f32.mrf.mxu1 }
  0xd8   : > { %v376_v16 = vadd.f32 %v552_v11, %v361_v12  ;;  %v359_v17 = vmul.f32 %v551_v9, %v321_v15  ;;  %v380_v19 = vadd.f32 %v552_v11, %v365_v14  ;;  %v363_v20 = vmul.f32 %v551_v9, %v337_v18 }
  0xd9   : > { %v583_v21 = vpop.f32.mrf.mxu0  ;;  %v587_v25 = vpop.f32.mrf.mxu1 }
  0xda   : > { %vm384_vm4 = vcmp.gt.f32.partialorder %v376_v16, 0.0  ;;  %v392_v22 = vmul.f32 0.2, %v376_v16  ;;  %v374_v23 = vadd.f32 %v552_v11, %v359_v17  ;;  %v362_v24 = vmul.f32 %v583_v21, %v551_v9 }
  0xdb   : > { %vm388_vm5 = vcmp.gt.f32.partialorder %v380_v19, 0.0  ;;  %v396_v26 = vmul.f32 0.2, %v380_v19  ;;  %v378_v27 = vadd.f32 %v552_v11, %v363_v20  ;;  %v366_v28 = vmul.f32 %v587_v25, %v551_v9  ;;  %v324_v32 = vpop.f32.mrf.mxu0  ;;  %v340_v36 = vpop.f32.mrf.mxu1 }
  0xdc   : > { %v400_v29 = vsel %vm384_vm4, %v376_v16, %v392_v22  ;;  %vm382_vm6 = vcmp.gt.f32.partialorder %v374_v23, 0.0  ;;  %v390_v30 = vmul.f32 0.2, %v374_v23  ;;  %v377_v31 = vadd.f32 %v552_v11, %v362_v24 }
  0xdd   : > { %v567_v33 = vpack.c.bf16 %v400_v29, %v400_v29  ;;  %v404_v34 = vsel %vm388_vm5, %v380_v19, %v396_v26  ;;  %vm386_vm7 = vcmp.gt.f32.partialorder %v378_v27, 0.0  ;;  %v394_v35 = vmul.f32 0.2, %v378_v27 }
  0xde   : > { %v571_v37 = vpack.c.bf16 %v404_v34, %v404_v34  ;;  %v398_v38 = vsel %vm382_vm6, %v374_v23, %v390_v30  ;;  %vm385_vm8 = vcmp.gt.f32.partialorder %v377_v31, 0.0  ;;  %v393_v39 = vmul.f32 0.2, %v377_v31 }
  0xdf   : > { %441 = vst.msk [vmem:[%s709_s5 + $0x8] sm:$0xf] %vm438_vm3, %v567_v33  ;;  %v565_v40 = vpack.c.bf16 %v398_v38, %v398_v38  ;;  %v402_v41 = vsel %vm386_vm7, %v378_v27, %v394_v35  ;;  %v381_v42 = vadd.f32 %v552_v11, %v366_v28  ;;  %v360_v43 = vmul.f32 %v551_v9, %v324_v32 }
  0xe0   : > { %445 = vst.msk [vmem:[%s709_s5 + $0x18] sm:$0xf] %vm438_vm3, %v571_v37  ;;  %v569_v44 = vpack.c.bf16 %v402_v41, %v402_v41  ;;  %v401_v45 = vsel %vm385_vm8, %v377_v31, %v393_v39  ;;  %v364_v46 = vmul.f32 %v551_v9, %v340_v36 }
  0xe1   : > { %439 = vst.msk [vmem:[%s709_s5] sm:$0xf] %vm438_vm3, %v565_v40  ;;  %v568_v47 = vpack.c.bf16 %v401_v45, %v401_v45  ;;  %vm389_vm9 = vcmp.gt.f32.partialorder %v381_v42, 0.0  ;;  %v397_v48 = vmul.f32 0.2, %v381_v42  ;;  %v375_v49 = vadd.f32 %v552_v11, %v360_v43 }
  0xe2   : > { %443 = vst.msk [vmem:[%s709_s5 + $0x10] sm:$0xf] %vm438_vm3, %v569_v44  ;;  %v379_v50 = vadd.f32 %v552_v11, %v364_v46 }
  0xe3   : > { %442 = vst.msk [vmem:[%s709_s5 + $0xc] sm:$0xf] %vm438_vm3, %v568_v47  ;;  %v405_v51 = vsel %vm389_vm9, %v381_v42, %v397_v48  ;;  %vm383_vm10 = vcmp.gt.f32.partialorder %v375_v49, 0.0  ;;  %v391_v52 = vmul.f32 0.2, %v375_v49 }
  0xe4   : > { %v572_v53 = vpack.c.bf16 %v405_v51, %v405_v51  ;;  %vm387_vm11 = vcmp.gt.f32.partialorder %v379_v50, 0.0  ;;  %v395_v54 = vmul.f32 0.2, %v379_v50 }
  0xe5   : > { %v399_v55 = vsel %vm383_vm10, %v375_v49, %v391_v52 }
  0xe6   : > { %446 = vst.msk [vmem:[%s709_s5 + $0x1c] sm:$0xf] %vm438_vm3, %v572_v53  ;;  %v566_v56 = vpack.c.bf16 %v399_v55, %v399_v55  ;;  %v403_v57 = vsel %vm387_vm11, %v379_v50, %v395_v54 }
  0xe7   : > { %v570_v58 = vpack.c.bf16 %v403_v57, %v403_v57 }
  0xe8   : > { %440 = vst.msk [vmem:[%s709_s5 + $0x4] sm:$0xf] %vm438_vm3, %v566_v56 }
  0xe9   : > { %444 = vst.msk [vmem:[%s709_s5 + $0x14] sm:$0xf] %vm438_vm3, %v570_v58 }
  0xea PF: > { %s14_s17 = sadd.s32 1, %s641_s17   ;;  %s741_s15 = smov %s637_s16 }
  0xeb   : > { %p11_p5 = scmp.ge.s32.totalorder %s14_s17, 4   ;;  %s742_s16 = smov %s744_s18 }
  0xed   :  { %13 = sbr.rel (!%p11_p5) target bundleno = 2 (0x2), region = 66 }

// kernel: encoder_forward.9
= control target key start
LH: loop header
LB: loop body
LE: loop exit
PB: predicated region body
PF: predicated region fallthrough
CT: control target
= control target key end

     0   :  { %s819_s18 = smov 0   ;;  %s821_s19 = smov 0   ;;  %s893_s0 = inlined_call_operand.vmem [shape: bf16[2,40,64], index: 0, kind: input, shape index: {}, may-alias: {0,1}]   ;;  %s894_s1 = inlined_call_operand.vmem [shape: bf16[2,40,64], index: 1, kind: input, shape index: {}, may-alias: {0,1}]   ;;  %s895_s2 = inlined_call_operand.vmem [shape: bf16[128,32], index: 2, kind: input, shape index: {}]   ;;  %s896_s3 = inlined_call_operand.vmem [shape: f32[1,32], index: 3, kind: input, shape index: {}]   ;;  %s897_s4 = inlined_call_operand.vmem [shape: f32[1,32], index: 4, kind: input, shape index: {}]   ;;  %s898_s5 = inlined_call_operand.vmem [shape: bf16[2,32,32], index: 5, kind: output, shape index: {}]  }
   0x1   :  { %s823_s20 = smov 0  }
   0x2 LB: > { %s27_s21 = sadd.s32 1, %s782_s19  ;;  %p651_p0 = scmp.ge.s32.totalorder %s786_s20, 1  ;;  %s786_s20 = sphi %s823_s20, %s15_s20   ;;  %s782_s19 = sphi %s821_s19, %s900_s19   ;;  %s778_s18 = sphi %s819_s18, %s899_s18  }
   0x3   : > { %p29_p1 = scmp.ge.s32.totalorder %s27_s21, 2  ;;  %p239_p2 = scmp.lt.s32.totalorder %s786_s20, 3 }
   0x5   : > { %s902_s21 = smov (%p29_p1, %s27_s21), 0  ;;  %p240_p3 = pnand %p651_p0, %p239_p2 }
   0x6   : > { %p294_p4 = scmp.lt.s32.totalorder (!%p240_p3), %s778_s18, 1  ;;  %s788_s15 = smov (!%p240_p3), 64  }
   0x7   : > { %243 = sbr.rel (%p240_p3) target bundleno = 358 (0x166), region = 40 }
   0xc   : > { %v756_v0 = vld [vmem:[%s895_s2 + $0x38] sm:$0xff]   ;;  %s904_s18 = smov (!%p294_p4, %s778_s18), 1  ;;  %v757_v1 = vld [vmem:[%s895_s2 + $0x30] sm:$0xff]   ;;  %v758_v2 = vld [vmem:[%s895_s2 + $0x28] sm:$0xff]   ;;  %vm345_vm0 = vcmask 1046528   ;;  %vm367_vm1 = vcmask 523264  }
   0xd   : > { %698 = vmatprep.subr.bf16.mxu0 %v756_v0  ;;  %s718_s26 = smul.u32 20, %s904_s18  ;;  %v759_v5 = vld [vmem:[%s895_s2 + $0x20] sm:$0xff]   ;;  %v760_v20 = vld [vmem:[%s895_s2 + $0x18] sm:$0xff]   ;;  %v761_v24 = vld [vmem:[%s895_s2 + $0x10] sm:$0xff]   ;;  %s674_s30 = sshll.u32 %s904_s18, 4  ;;  %vm537_vm3 = vcmask 257024  }
   0xe   : > { %699 = vmatpush3.bf16.msra.mxu0 %v756_v0  ;;  %v762_v25 = vld [vmem:[%s895_s2 + $0x8] sm:$0xff]   ;;  %v763_v26 = vld [vmem:[%s895_s2] sm:$0xff]   ;;  %s327_s8 = scalar_lea.vmem %s898_s5, %s674_s30 }
   0xf   : > { %700 = vmatprep.subr.bf16.mxu0 %v757_v1  ;;  %s301_s6 = scalar_lea.vmem %s893_s0, %s718_s26  ;;  %s673_s7 = sadd.s32 16, %s718_s26  ;;  %v664_v39 = vld [vmem:[%s896_s3] ss:$0 sm:$0xff] }
  0x10   : > { %v680_v3 = vld [vmem:[%s301_s6] sm:$0xff]   ;;  %v687_v4 = vld [vmem:[%s301_s6 + $0x8] sm:$0xff]   ;;  %s316_s10 = scalar_lea.vmem %s894_s1, %s673_s7 }
  0x11   : > { %v681_v6 = vunpack.c.l.bf16 %v680_v3  ;;  %v682_v7 = vunpack.c.h.bf16 %v680_v3  ;;  %v685_v8 = vunpack.c.l.bf16 %v687_v4  ;;  %v686_v9 = vunpack.c.h.bf16 %v687_v4  ;;  %v338_v10 = vld [vmem:[%s316_s10] sm:$0xf] }
  0x12   : > { %701 = vmatpush3.bf16.msra.mxu0 %v757_v1  ;;  %v339_v11 = vunpack.c.l.bf16 %v338_v10  ;;  %v665_v41 = vld [vmem:[%s897_s4] ss:$0 sm:$0xff] }
  0x13   : > { %702 = vmatprep.subr.bf16.mxu0 %v758_v2  ;;  %v346_v12 = vrot.slane %v681_v6, 1  ;;  %v347_v13 = vrot.slane %v682_v7, 1  ;;  %v349_v14 = vrot.slane %v685_v8, 1  ;;  %v351_v15 = vrot.slane %v686_v9, 1 }
  0x14   : > { %v353_v16 = vrot.slane %v339_v11, 1 }
  0x15   : > { %v348_v17 = vsel %vm345_vm0, %v346_v12, %v347_v13  ;;  %v350_v18 = vsel %vm345_vm0, %v347_v13, %v349_v14  ;;  %v352_v19 = vsel %vm345_vm0, %v349_v14, %v351_v15 }
  0x16   : > { %703 = vmatpush3.bf16.msra.mxu0 %v758_v2  ;;  %v746_v21 = vpack.i.bf16 %v350_v18, %v348_v17  ;;  %v354_v22 = vsel %vm345_vm0, %v351_v15, %v353_v16 }
  0x17   : > { %704 = vmatprep.subr.bf16.mxu0 %v759_v5  ;;  %v751_v23 = vpack.i.bf16 %v354_v22, %v352_v19 }
  0x18   : > { %747 = vrot.lane.b32.xlu0 %v746_v21, %s788_s15 }
  0x1a   : > { %705 = vmatpush3.bf16.msra.mxu0 %v759_v5 }
  0x1b   : > { %706 = vmatprep.subr.bf16.mxu0 %v760_v20 }
  0x1c   : > { %752 = vrot.lane.b32.xlu0 %v751_v23, %s788_s15 }
  0x1e   : > { %707 = vmatpush3.bf16.msra.mxu0 %v760_v20 }
  0x1f   : > { %708 = vmatprep.subr.bf16.mxu0 %v761_v24 }
  0x22   : > { %709 = vmatpush3.bf16.msra.mxu0 %v761_v24 }
  0x23   : > { %710 = vmatprep.subr.bf16.mxu0 %v762_v25 }
  0x26   : > { %711 = vmatpush3.bf16.msra.mxu0 %v762_v25 }
  0x27   : > { %712 = vmatprep.subr.bf16.mxu0 %v763_v26 }
  0x2a   : > { %713 = vmatpush3.bf16.msra.mxu0 %v763_v26 }
  0x8a   : > { %v748_v27 = vpop.permute.xlu0 %747 }
  0x8b   : > { %v750_v28 = vunpack.i.h.bf16 %v748_v27  ;;  %v749_v29 = vunpack.i.l.bf16 %v748_v27 }
  0x8d   : > { %v368_v30 = vsel %vm367_vm1, %v681_v6, %v749_v29  ;;  %v369_v31 = vsel %vm367_vm1, %v682_v7, %v750_v28 }
  0x8e   : > { %v753_v32 = vpop.permute.xlu0 %752  ;;  %v372_v33 = vpack.c.bf16 %v369_v31, %v368_v30 }
  0x8f   : > { %v755_v34 = vunpack.i.h.bf16 %v753_v32  ;;  %v754_v35 = vunpack.i.l.bf16 %v753_v32 }
  0x90   : > { %714 = vmatprep.mubr.bf16.mxu0 %v372_v33 }
  0x91   : > { %v370_v36 = vsel %vm367_vm1, %v685_v8, %v754_v35  ;;  %v371_v37 = vsel %vm367_vm1, %v686_v9, %v755_v34 }
  0x92   : > { %v373_v38 = vpack.c.bf16 %v371_v37, %v370_v36 }
  0x94   : > { %715 = vmatmul.mubr.bf16.vlgmr.msra.gmra.mxu0 %v373_v38 }
 0x154   : > { %v716_v40 = vpop.f32.mrf.mxu0 }
 0x155   : > { %v496_v42 = vmul.f32 %v716_v40, %v664_v39 }
 0x156   : > { %v472_v43 = vpop.f32.mrf.mxu0 }
 0x157   : > { %v507_v44 = vadd.f32 %v665_v41, %v496_v42  ;;  %v494_v45 = vmul.f32 %v664_v39, %v472_v43 }
 0x158   : > { %v717_v46 = vpop.f32.mrf.mxu0 }
 0x159   : > { %vm511_vm2 = vcmp.gt.f32.partialorder %v507_v44, 0.0  ;;  %v515_v47 = vmul.f32 0.2, %v507_v44  ;;  %v505_v48 = vadd.f32 %v665_v41, %v494_v45  ;;  %v497_v49 = vmul.f32 %v717_v46, %v664_v39 }
 0x15a   : > { %v475_v50 = vpop.f32.mrf.mxu0 }
 0x15b   : > { %v519_v51 = vsel %vm511_vm2, %v507_v44, %v515_v47  ;;  %vm509_vm4 = vcmp.gt.f32.partialorder %v505_v48, 0.0  ;;  %v513_v52 = vmul.f32 0.2, %v505_v48  ;;  %v508_v53 = vadd.f32 %v665_v41, %v497_v49 }
 0x15c   : > { %v677_v54 = vpack.c.bf16 %v519_v51, %v519_v51  ;;  %v495_v55 = vmul.f32 %v664_v39, %v475_v50 }
 0x15d   : > { %v517_v56 = vsel %vm509_vm4, %v505_v48, %v513_v52  ;;  %vm512_vm5 = vcmp.gt.f32.partialorder %v508_v53, 0.0  ;;  %v516_v57 = vmul.f32 0.2, %v508_v53 }
 0x15e   : > { %540 = vst.msk [vmem:[%s327_s8 + $0x8] sm:$0xf] %vm537_vm3, %v677_v54  ;;  %v675_v58 = vpack.c.bf16 %v517_v56, %v517_v56  ;;  %v506_v59 = vadd.f32 %v665_v41, %v495_v55 }
 0x15f   : > { %v520_v60 = vsel %vm512_vm5, %v508_v53, %v516_v57 }
 0x160   : > { %538 = vst.msk [vmem:[%s327_s8] sm:$0xf] %vm537_vm3, %v675_v58  ;;  %v678_v61 = vpack.c.bf16 %v520_v60, %v520_v60  ;;  %vm510_vm6 = vcmp.gt.f32.partialorder %v506_v59, 0.0  ;;  %v514_v62 = vmul.f32 0.2, %v506_v59 }
 0x162   : > { %541 = vst.msk [vmem:[%s327_s8 + $0xc] sm:$0xf] %vm537_vm3, %v678_v61  ;;  %v518_v63 = vsel %vm510_vm6, %v506_v59, %v514_v62 }
 0x163   : > { %v676_v0 = vpack.c.bf16 %v518_v63, %v518_v63 }
 0x165   : > { %539 = vst.msk [vmem:[%s327_s8 + $0x4] sm:$0xf] %vm537_vm3, %v676_v0 }
 0x166 PF: > { %s15_s20 = sadd.s32 1, %s786_s20   ;;  %s899_s18 = smov %s782_s19 }
 0x167   : > { %p12_p5 = scmp.ge.s32.totalorder %s15_s20, 4   ;;  %s900_s19 = smov %s902_s21 }
 0x169   :  { %14 = sbr.rel (!%p12_p5) target bundleno = 2 (0x2), region = 73 }

// kernel: encoder_forward.10
= control target key start
LH: loop header
LB: loop body
LE: loop exit
PB: predicated region body
PF: predicated region fallthrough
CT: control target
= control target key end

     0   :  { %s761_s18 = smov 0   ;;  %s763_s19 = smov 0   ;;  %s831_s0 = inlined_call_operand.vmem [shape: bf16[2,24,64], index: 0, kind: input, shape index: {}, may-alias: {0,1}]   ;;  %s832_s1 = inlined_call_operand.vmem [shape: bf16[2,24,64], index: 1, kind: input, shape index: {}, may-alias: {0,1}]   ;;  %s833_s2 = inlined_call_operand.vmem [shape: bf16[128,32], index: 2, kind: input, shape index: {}]   ;;  %s834_s3 = inlined_call_operand.vmem [shape: f32[1,32], index: 3, kind: input, shape index: {}]   ;;  %s835_s4 = inlined_call_operand.vmem [shape: f32[1,32], index: 4, kind: input, shape index: {}]   ;;  %s836_s5 = inlined_call_operand.vmem [shape: bf16[2,16,32], index: 5, kind: output, shape index: {}]  }
   0x1   :  { %s765_s20 = smov 0  }
   0x2 LB: > { %s27_s21 = sadd.s32 1, %s722_s19  ;;  %p604_p0 = scmp.ge.s32.totalorder %s726_s20, 1  ;;  %s726_s20 = sphi %s765_s20, %s15_s20   ;;  %s722_s19 = sphi %s763_s19, %s838_s19   ;;  %s718_s18 = sphi %s761_s18, %s837_s18  }
   0x3   : > { %p29_p1 = scmp.ge.s32.totalorder %s27_s21, 2  ;;  %p239_p2 = scmp.lt.s32.totalorder %s726_s20, 3 }
   0x5   : > { %s840_s21 = smov (%p29_p1, %s27_s21), 0  ;;  %p240_p3 = pnand %p604_p0, %p239_p2 }
   0x6   : > { %p294_p4 = scmp.lt.s32.totalorder (!%p240_p3), %s718_s18, 1  ;;  %s730_s15 = smov (!%p240_p3), 64  }
   0x7   : > { %243 = sbr.rel (%p240_p3) target bundleno = 352 (0x160), region = 40 }
   0xc   : > { %v728_v0 = vmov 0.0   ;;  %v696_v1 = vld [vmem:[%s833_s2 + $0x38] sm:$0xff]   ;;  %s842_s18 = smov (!%p294_p4, %s718_s18), 1  ;;  %v697_v2 = vld [vmem:[%s833_s2 + $0x30] sm:$0xff]   ;;  %vm729_vm0 = vmmov 0   ;;  %v698_v4 = vld [vmem:[%s833_s2 + $0x28] sm:$0xff]  }
   0xd   : > { %641 = vmatprep.subr.bf16.mxu0 %v728_v0  ;;  %s661_s26 = smul.u32 12, %s842_s18  ;;  %657 = vmatprep.mubr.msk.bf16.mxu0 %vm729_vm0, %v728_v0  ;;  %vm339_vm1 = vcmask 1046528   ;;  %v699_v12 = vld [vmem:[%s833_s2 + $0x20] sm:$0xff]   ;;  %v700_v16 = vld [vmem:[%s833_s2 + $0x18] sm:$0xff]   ;;  %v701_v17 = vld [vmem:[%s833_s2 + $0x10] sm:$0xff]   ;;  %vm351_vm2 = vcmask 523264  }
   0xe   : > { %642 = vmatpush3.bf16.msra.mxu0 %v696_v1  ;;  %v702_v18 = vld [vmem:[%s833_s2 + $0x8] sm:$0xff]   ;;  %v703_v19 = vld [vmem:[%s833_s2] sm:$0xff]   ;;  %vm492_vm4 = vcmask 257024  }
   0xf   : > { %643 = vmatprep.subr.bf16.mxu0 %v728_v0  ;;  %s301_s29 = scalar_lea.vmem %s831_s0, %s661_s26  ;;  %s624_s30 = sadd.s32 8, %s661_s26  ;;  %v617_v26 = vld [vmem:[%s834_s3] ss:$0 sm:$0xff] }
  0x10   : > { %s316_s8 = scalar_lea.vmem %s832_s1, %s624_s30  ;;  %v629_v3 = vld [vmem:[%s301_s29] sm:$0xff]   ;;  %s625_s30 = sshll.u32 %s842_s18, 3 }
  0x11   : > { %v630_v5 = vunpack.c.l.bf16 %v629_v3  ;;  %v631_v6 = vunpack.c.h.bf16 %v629_v3  ;;  %v334_v7 = vld [vmem:[%s316_s8] sm:$0xf]  ;;  %s327_s8 = scalar_lea.vmem %s836_s5, %s625_s30 }
  0x12   : > { %644 = vmatpush3.bf16.msra.mxu0 %v697_v2  ;;  %v335_v8 = vunpack.c.l.bf16 %v334_v7  ;;  %v618_v28 = vld [vmem:[%s835_s4] ss:$0 sm:$0xff] }
  0x13   : > { %645 = vmatprep.subr.bf16.mxu0 %v728_v0  ;;  %v340_v9 = vrot.slane %v630_v5, 1  ;;  %v341_v10 = vrot.slane %v631_v6, 1 }
  0x14   : > { %v343_v11 = vrot.slane %v335_v8, 1 }
  0x15   : > { %v342_v13 = vsel %vm339_vm1, %v340_v9, %v341_v10 }
  0x16   : > { %646 = vmatpush3.bf16.msra.mxu0 %v698_v4  ;;  %v344_v14 = vsel %vm339_vm1, %v341_v10, %v343_v11 }
  0x17   : > { %647 = vmatprep.subr.bf16.mxu0 %v728_v0  ;;  %v691_v15 = vpack.i.bf16 %v344_v14, %v342_v13 }
  0x19   : > { %692 = vrot.lane.b32.xlu0 %v691_v15, %s730_s15 }
  0x1a   : > { %648 = vmatpush3.bf16.msra.mxu0 %v699_v12 }
  0x1b   : > { %649 = vmatprep.subr.bf16.mxu0 %v728_v0 }
  0x1e   : > { %650 = vmatpush3.bf16.msra.mxu0 %v700_v16 }
  0x1f   : > { %651 = vmatprep.subr.bf16.mxu0 %v728_v0 }
  0x22   : > { %652 = vmatpush3.bf16.msra.mxu0 %v701_v17 }
  0x23   : > { %653 = vmatprep.subr.bf16.mxu0 %v728_v0 }
  0x26   : > { %654 = vmatpush3.bf16.msra.mxu0 %v702_v18 }
  0x27   : > { %655 = vmatprep.subr.bf16.mxu0 %v728_v0 }
  0x2a   : > { %656 = vmatpush3.bf16.msra.mxu0 %v703_v19 }
  0x8b   : > { %v693_v20 = vpop.permute.xlu0 %692 }
  0x8c   : > { %v695_v21 = vunpack.i.h.bf16 %v693_v20  ;;  %v694_v22 = vunpack.i.l.bf16 %v693_v20 }
  0x8e   : > { %v352_v23 = vsel %vm351_vm2, %v630_v5, %v694_v22  ;;  %v353_v24 = vsel %vm351_vm2, %v631_v6, %v695_v21 }
  0x8f   : > { %v354_v25 = vpack.c.bf16 %v353_v24, %v352_v23 }
  0x91   : > { %658 = vmatmul.mubr.bf16.vlgmr.msra.gmra.mxu0 %v354_v25 }
 0x151   : > { %v453_v27 = vpop.f32.mrf.mxu0 }
 0x152   : > { %v467_v29 = vmul.f32 %v617_v26, %v453_v27 }
 0x153   : > { %v659_v30 = vpop.f32.mrf.mxu0 }
 0x154   : > { %v476_v31 = vadd.f32 %v618_v28, %v467_v29 }
 0x155   : > { %v456_v32 = vpop.f32.mrf.mxu0 }
 0x156   : > { %vm478_vm3 = vcmp.gt.f32.partialorder %v476_v31, 0.0  ;;  %v480_v33 = vmul.f32 0.2, %v476_v31  ;;  %v468_v34 = vmul.f32 %v617_v26, %v456_v32 }
 0x157   : > { %v660_v35 = vpop.f32.mrf.mxu0 }
 0x158   : > { %v482_v36 = vsel %vm478_vm3, %v476_v31, %v480_v33  ;;  %v477_v37 = vadd.f32 %v618_v28, %v468_v34 }
 0x159   : > { %v626_v38 = vpack.c.bf16 %v482_v36, %v482_v36 }
 0x15a   : > { %vm479_vm5 = vcmp.gt.f32.partialorder %v477_v37, 0.0  ;;  %v481_v39 = vmul.f32 0.2, %v477_v37 }
 0x15b   : > { %493 = vst.msk [vmem:[%s327_s8] sm:$0xf] %vm492_vm4, %v626_v38 }
 0x15c   : > { %v483_v40 = vsel %vm479_vm5, %v477_v37, %v481_v39 }
 0x15d   : > { %v627_v41 = vpack.c.bf16 %v483_v40, %v483_v40 }
 0x15f   : > { %494 = vst.msk [vmem:[%s327_s8 + $0x4] sm:$0xf] %vm492_vm4, %v627_v41 }
 0x160 PF: > { %s15_s20 = sadd.s32 1, %s726_s20   ;;  %s837_s18 = smov %s722_s19 }
 0x161   : > { %p12_p5 = scmp.ge.s32.totalorder %s15_s20, 4   ;;  %s838_s19 = smov %s840_s21 }
 0x163   :  { %14 = sbr.rel (!%p12_p5) target bundleno = 2 (0x2), region = 73 }

// kernel: encoder_forward.11
= control target key start
LH: loop header
LB: loop body
LE: loop exit
PB: predicated region body
PF: predicated region fallthrough
CT: control target
= control target key end

     0   :  { %s677_s18 = smov 0   ;;  %s679_s19 = smov 0   ;;  %s747_s0 = inlined_call_operand.vmem [shape: bf16[2,16,64], index: 0, kind: input, shape index: {}, may-alias: {0,1}]   ;;  %s748_s1 = inlined_call_operand.vmem [shape: bf16[2,16,64], index: 1, kind: input, shape index: {}, may-alias: {0,1}]   ;;  %s749_s2 = inlined_call_operand.vmem [shape: bf16[128,32], index: 2, kind: input, shape index: {}]   ;;  %s750_s3 = inlined_call_operand.vmem [shape: f32[1,32], index: 3, kind: input, shape index: {}]   ;;  %s751_s4 = inlined_call_operand.vmem [shape: f32[1,32], index: 4, kind: input, shape index: {}]   ;;  %s752_s5 = inlined_call_operand.vmem [shape: bf16[2,8,32], index: 5, kind: output, shape index: {}]  }
   0x1   :  { %s681_s20 = smov 0  }
   0x2 LB: > { %s27_s21 = sadd.s32 1, %s638_s19  ;;  %p534_p0 = scmp.ge.s32.totalorder %s642_s20, 1  ;;  %s642_s20 = sphi %s681_s20, %s15_s20   ;;  %s638_s19 = sphi %s679_s19, %s754_s19   ;;  %s634_s18 = sphi %s677_s18, %s753_s18  }
   0x3   : > { %p29_p1 = scmp.ge.s32.totalorder %s27_s21, 2  ;;  %p225_p2 = scmp.lt.s32.totalorder %s642_s20, 3 }
   0x5   : > { %s756_s21 = smov (%p29_p1, %s27_s21), 0  ;;  %p226_p3 = pnand %p534_p0, %p225_p2 }
   0x6   : > { %p267_p4 = scmp.lt.s32.totalorder (!%p226_p3), %s634_s18, 1  ;;  %s646_s13 = smov (!%p226_p3), 64  }
   0x7   : > { %229 = sbr.rel (%p226_p3) target bundleno = 343 (0x157), region = 40 }
   0xc   : > { %v644_v0 = vmov 0.0   ;;  %v612_v1 = vld [vmem:[%s749_s2 + $0x38] sm:$0xff]   ;;  %s758_s18 = smov (!%p267_p4, %s634_s18), 1  ;;  %v613_v2 = vld [vmem:[%s749_s2 + $0x30] sm:$0xff]   ;;  %vm645_vm0 = vmmov 0   ;;  %v614_v3 = vld [vmem:[%s749_s2 + $0x28] sm:$0xff]  }
   0xd   : > { %565 = vmatprep.subr.bf16.mxu0 %v644_v0  ;;  %s552_s26 = sshll.u32 %s758_s18, 3  ;;  %581 = vmatprep.mubr.msk.bf16.mxu0 %vm645_vm0, %v644_v0  ;;  %vm299_vm1 = vcmask 1046528   ;;  %v615_v10 = vld [vmem:[%s749_s2 + $0x20] sm:$0xff]   ;;  %v616_v12 = vld [vmem:[%s749_s2 + $0x18] sm:$0xff]   ;;  %v617_v13 = vld [vmem:[%s749_s2 + $0x10] sm:$0xff]   ;;  %vm306_vm2 = vcmask 523264  }
   0xe   : > { %566 = vmatpush3.bf16.msra.mxu0 %v612_v1  ;;  %s274_s29 = scalar_lea.vmem %s747_s0, %s552_s26  ;;  %s554_s30 = sadd.s32 4, %s552_s26  ;;  %v618_v14 = vld [vmem:[%s749_s2 + $0x8] sm:$0xff]   ;;  %v619_v15 = vld [vmem:[%s749_s2] sm:$0xff]   ;;  %vm433_vm4 = vcmask 257024  }
   0xf   : > { %567 = vmatprep.subr.bf16.mxu0 %v644_v0  ;;  %s283_s10 = scalar_lea.vmem %s748_s1, %s554_s30  ;;  %v293_v4 = vld [vmem:[%s274_s29] sm:$0xf]  ;;  %s539_s30 = sshll.u32 %s758_s18, 2 }
  0x10   : > { %v294_v5 = vunpack.c.l.bf16 %v293_v4  ;;  %v295_v6 = vld [vmem:[%s283_s10] sm:$0xf]  ;;  %s291_s8 = scalar_lea.vmem %s752_s5, %s539_s30 }
  0x11   : > { %v296_v7 = vunpack.c.l.bf16 %v295_v6  ;;  %v548_v19 = vld [vmem:[%s750_s3] ss:$0 sm:$0xff] }
  0x12   : > { %568 = vmatpush3.bf16.msra.mxu0 %v613_v2  ;;  %v300_v8 = vrot.slane %v294_v5, 1  ;;  %v549_v21 = vld [vmem:[%s751_s4] ss:$0 sm:$0xff] }
  0x13   : > { %569 = vmatprep.subr.bf16.mxu0 %v644_v0  ;;  %v301_v9 = vrot.slane %v296_v7, 1 }
  0x15   : > { %v302_v11 = vsel %vm299_vm1, %v300_v8, %v301_v9 }
  0x16   : > { %570 = vmatpush3.bf16.msra.mxu0 %v614_v3  ;;  %303 = vrot.lane.b32.xlu0 %v302_v11, %s646_s13 }
  0x17   : > { %571 = vmatprep.subr.bf16.mxu0 %v644_v0 }
  0x1a   : > { %572 = vmatpush3.bf16.msra.mxu0 %v615_v10 }
  0x1b   : > { %573 = vmatprep.subr.bf16.mxu0 %v644_v0 }
  0x1e   : > { %574 = vmatpush3.bf16.msra.mxu0 %v616_v12 }
  0x1f   : > { %575 = vmatprep.subr.bf16.mxu0 %v644_v0 }
  0x22   : > { %576 = vmatpush3.bf16.msra.mxu0 %v617_v13 }
  0x23   : > { %577 = vmatprep.subr.bf16.mxu0 %v644_v0 }
  0x26   : > { %578 = vmatpush3.bf16.msra.mxu0 %v618_v14 }
  0x27   : > { %579 = vmatprep.subr.bf16.mxu0 %v644_v0 }
  0x2a   : > { %580 = vmatpush3.bf16.msra.mxu0 %v619_v15 }
  0x88   : > { %v304_v16 = vpop.permute.xlu0 %303 }
  0x89   : > { %v307_v17 = vsel %vm306_vm2, %v294_v5, %v304_v16 }
  0x8a   : > { %v308_v18 = vpack.c.bf16 %v307_v17, %v307_v17 }
  0x8c   : > { %582 = vmatmul.mubr.bf16.vlgmr.msra.gmra.mxu0 %v308_v18 }
 0x14c   : > { %v407_v20 = vpop.f32.mrf.mxu0 }
 0x14d   : > { %v420_v22 = vmul.f32 %v548_v19, %v407_v20 }
 0x14e   : > { %v583_v23 = vpop.f32.mrf.mxu0 }
 0x14f   : > { %v428_v24 = vadd.f32 %v549_v21, %v420_v22 }
 0x150   : > { %v410_v25 = vpop.f32.mrf.mxu0 }
 0x151   : > { %vm429_vm3 = vcmp.gt.f32.partialorder %v428_v24, 0.0  ;;  %v430_v26 = vmul.f32 0.2, %v428_v24 }
 0x152   : > { %v584_v27 = vpop.f32.mrf.mxu0 }
 0x153   : > { %v431_v28 = vsel %vm429_vm3, %v428_v24, %v430_v26 }
 0x154   : > { %v432_v29 = vpack.c.bf16 %v431_v28, %v431_v28 }
 0x156   : > { %434 = vst.msk [vmem:[%s291_s8] sm:$0xf] %vm433_vm4, %v432_v29 }
 0x157 PF: > { %s15_s20 = sadd.s32 1, %s642_s20   ;;  %s753_s18 = smov %s638_s19 }
 0x158   : > { %p12_p5 = scmp.ge.s32.totalorder %s15_s20, 4   ;;  %s754_s19 = smov %s756_s21 }
 0x15a   :  { %14 = sbr.rel (!%p12_p5) target bundleno = 2 (0x2), region = 73 }

// kernel: encoder_forward.15
= control target key start
LH: loop header
LB: loop body
LE: loop exit
PB: predicated region body
PF: predicated region fallthrough
CT: control target
= control target key end

     0   :  { %s665_s18 = smov 0   ;;  %s667_s19 = smov 0   ;;  %s732_s0 = inlined_call_operand.vmem [shape: bf16[2,16,32], index: 0, kind: input, shape index: {}, may-alias: {0,1}]   ;;  %s733_s1 = inlined_call_operand.vmem [shape: bf16[2,16,32], index: 1, kind: input, shape index: {}, may-alias: {0,1}]   ;;  %s734_s2 = inlined_call_operand.vmem [shape: bf16[96,32], index: 2, kind: input, shape index: {}]   ;;  %s735_s3 = inlined_call_operand.vmem [shape: f32[1,32], index: 3, kind: input, shape index: {}]   ;;  %s736_s4 = inlined_call_operand.vmem [shape: f32[1,32], index: 4, kind: input, shape index: {}]   ;;  %s737_s5 = inlined_call_operand.vmem [shape: f32[2,8,32], index: 5, kind: output, shape index: {}]  }
   0x1   :  { %s669_s20 = smov 0  }
   0x2 LB: > { %s27_s21 = sadd.s32 1, %s625_s19  ;;  %p529_p0 = scmp.ge.s32.totalorder %s629_s20, 1  ;;  %s629_s20 = sphi %s669_s20, %s15_s20   ;;  %s625_s19 = sphi %s667_s19, %s739_s19   ;;  %s621_s18 = sphi %s665_s18, %s738_s18  }
   0x3   : > { %p29_p1 = scmp.ge.s32.totalorder %s27_s21, 2  ;;  %p225_p2 = scmp.lt.s32.totalorder %s629_s20, 3 }
   0x5   : > { %s741_s21 = smov (%p29_p1, %s27_s21), 0  ;;  %p226_p3 = pnand %p529_p0, %p225_p2 }
   0x6   : > { %p267_p4 = scmp.lt.s32.totalorder (!%p226_p3), %s621_s18, 1  ;;  %s633_s13 = smov (!%p226_p3), 32  }
   0x7   : > { %229 = sbr.rel (%p226_p3) target bundleno = 345 (0x159), region = 40  ;;  %s634_s16 = smov (!%p226_p3), 64  }
   0xc   : > { %v601_v0 = vld [vmem:[%s734_s2 + $0x28] sm:$0xff]   ;;  %v631_v1 = vmov 0.0   ;;  %s743_s18 = smov (!%p267_p4, %s621_s18), 1  ;;  %v602_v2 = vld [vmem:[%s734_s2 + $0x20] sm:$0xff]   ;;  %v603_v3 = vld [vmem:[%s734_s2 + $0x18] sm:$0xff]   ;;  %vm632_vm0 = vmmov 0  }
   0xd   : > { %557 = vmatprep.subr.bf16.mxu0 %v631_v1  ;;  %s689_s26 = sshll.u32 %s743_s18, 3  ;;  %569 = vmatprep.mubr.msk.bf16.mxu0 %vm632_vm0, %v631_v1  ;;  %vm299_vm1 = vcmask 1046528   ;;  %v604_v12 = vld [vmem:[%s734_s2 + $0x10] sm:$0xff]   ;;  %vm306_vm2 = vcmask 1045504   ;;  %v605_v15 = vld [vmem:[%s734_s2 + $0x8] sm:$0xff]   ;;  %v606_v16 = vld [vmem:[%s734_s2] sm:$0xff]  }
   0xe   : > { %558 = vmatpush3.bf16.msra.mxu0 %v601_v0  ;;  %s274_s29 = scalar_lea.vmem %s732_s0, %s689_s26  ;;  %s548_s30 = sadd.s32 4, %s689_s26  ;;  %vm313_vm3 = vcmask 261120   ;;  %vm315_vm4 = vcmask 523264   ;;  %vm366_vm5 = vcmask 785408   ;;  %v542_v22 = vld [vmem:[%s735_s3] ss:$0 sm:$0xff] }
   0xf   : > { %559 = vmatprep.subr.bf16.mxu0 %v631_v1  ;;  %s283_s10 = scalar_lea.vmem %s733_s1, %s548_s30  ;;  %v293_v4 = vld [vmem:[%s274_s29] sm:$0xf]  ;;  %s291_s29 = scalar_lea.vmem %s737_s5, %s689_s26 }
  0x10   : > { %v294_v5 = vunpack.c.l.bf16 %v293_v4  ;;  %v295_v6 = vld [vmem:[%s283_s10] sm:$0xf] }
  0x11   : > { %v296_v7 = vunpack.c.l.bf16 %v295_v6  ;;  %v543_v24 = vld [vmem:[%s736_s4] ss:$0 sm:$0xff] }
  0x12   : > { %560 = vmatpush3.bf16.msra.mxu0 %v602_v2  ;;  %v300_v8 = vrot.slane %v294_v5, 1  ;;  %v307_v10 = vrot.slane %v294_v5, 2 }
  0x13   : > { %561 = vmatprep.subr.bf16.mxu0 %v631_v1  ;;  %v301_v9 = vrot.slane %v296_v7, 1  ;;  %v308_v11 = vrot.slane %v296_v7, 2 }
  0x15   : > { %v302_v13 = vsel %vm299_vm1, %v300_v8, %v301_v9  ;;  %v309_v14 = vsel %vm306_vm2, %v307_v10, %v308_v11 }
  0x16   : > { %562 = vmatpush3.bf16.msra.mxu0 %v603_v3  ;;  %303 = vrot.lane.b32.xlu0 %v302_v13, %s633_s13 }
  0x17   : > { %563 = vmatprep.subr.bf16.mxu0 %v631_v1 }
  0x1a   : > { %564 = vmatpush3.bf16.msra.mxu0 %v604_v12  ;;  %310 = vrot.lane.b32.xlu0 %v309_v14, %s634_s16 }
  0x1b   : > { %565 = vmatprep.subr.bf16.mxu0 %v631_v1 }
  0x1e   : > { %566 = vmatpush3.bf16.msra.mxu0 %v605_v15 }
  0x1f   : > { %567 = vmatprep.subr.bf16.mxu0 %v631_v1 }
  0x22   : > { %568 = vmatpush3.bf16.msra.mxu0 %v606_v16 }
  0x88   : > { %v304_v17 = vpop.permute.xlu0 %303 }
  0x89   : > { %v314_v18 = vsel %vm313_vm3, %v294_v5, %v304_v17 }
  0x8c   : > { %v311_v19 = vpop.permute.xlu0 %310 }
  0x8d   : > { %v316_v20 = vsel %vm315_vm4, %v314_v18, %v311_v19 }
  0x8e   : > { %v317_v21 = vpack.c.bf16 %v316_v20, %v316_v20 }
  0x90   : > { %570 = vmatmul.mubr.msk.bf16.vlgmr.msra.gmra.mxu0 %vm366_vm5, %v317_v21 }
 0x150   : > { %v404_v23 = vpop.f32.mrf.mxu0 }
 0x151   : > { %v417_v25 = vmul.f32 %v542_v22, %v404_v23 }
 0x152   : > { %v571_v26 = vpop.f32.mrf.mxu0 }
 0x153   : > { %v425_v27 = vadd.f32 %v543_v24, %v417_v25 }
 0x154   : > { %v407_v28 = vpop.f32.mrf.mxu0 }
 0x155   : > { %vm426_vm6 = vcmp.gt.f32.partialorder %v425_v27, 0.0  ;;  %v427_v29 = vmul.f32 0.2, %v425_v27 }
 0x156   : > { %v572_v30 = vpop.f32.mrf.mxu0 }
 0x157   : > { %v428_v31 = vsel %vm426_vm6, %v425_v27, %v427_v29 }
 0x158   : > { %429 = vst.msk [vmem:[%s291_s29] sm:$0xff] %vm313_vm3, %v428_v31 }
 0x159 PF: > { %s15_s20 = sadd.s32 1, %s629_s20   ;;  %s738_s18 = smov %s625_s19 }
 0x15a   : > { %p12_p5 = scmp.ge.s32.totalorder %s15_s20, 4   ;;  %s739_s19 = smov %s741_s21 }
 0x15c   :  { %14 = sbr.rel (!%p12_p5) target bundleno = 2 (0x2), region = 73 }

// kernel: encoder_forward.13
= control target key start
LH: loop header
LB: loop body
LE: loop exit
PB: predicated region body
PF: predicated region fallthrough
CT: control target
= control target key end

     0   :  { %s954_s27 = smov 0   ;;  %s956_s28 = smov 0   ;;  %s1076_s0 = inlined_call_operand.vmem [shape: bf16[2,16,32], index: 0, kind: input, shape index: {}, may-alias: {0,1}]   ;;  %s1077_s1 = inlined_call_operand.vmem [shape: bf16[2,16,32], index: 1, kind: input, shape index: {}, may-alias: {0,1}]   ;;  %s1078_s2 = inlined_call_operand.vmem [shape: bf16[96,32], index: 2, kind: input, shape index: {}]   ;;  %s1079_s3 = inlined_call_operand.vmem [shape: f32[1,32], index: 3, kind: input, shape index: {}]   ;;  %s1080_s4 = inlined_call_operand.vmem [shape: f32[1,32], index: 4, kind: input, shape index: {}]   ;;  %s1081_s5 = inlined_call_operand.vmem [shape: bf16[96,32], index: 5, kind: input, shape index: {}]   ;;  %s1082_s6 = inlined_call_operand.vmem [shape: f32[1,32], index: 6, kind: input, shape index: {}]   ;;  %s1083_s7 = inlined_call_operand.vmem [shape: f32[1,32], index: 7, kind: input, shape index: {}]   ;;  %s1084_s8 = inlined_call_operand.vmem [shape: bf16[2,8,32], index: 8, kind: output, shape index: {}]  }
   0x1   :  { %s958_s29 = smov 0  }
   0x2 LB: > { %s30_s30 = sadd.s32 1, %s899_s28  ;;  %p755_p0 = scmp.ge.s32.totalorder %s903_s29, 1  ;;  %s903_s29 = sphi %s958_s29, %s18_s29   ;;  %s899_s28 = sphi %s956_s28, %s1086_s28   ;;  %s895_s27 = sphi %s954_s27, %s1085_s27  }
   0x3   : > { %p32_p1 = scmp.ge.s32.totalorder %s30_s30, 2  ;;  %p300_p2 = scmp.lt.s32.totalorder %s903_s29, 3 }
   0x5   : > { %s1088_s30 = smov (%p32_p1, %s30_s30), 0  ;;  %p301_p3 = pnand %p755_p0, %p300_p2 }
   0x6   : > { %p348_p4 = scmp.lt.s32.totalorder (!%p301_p3), %s895_s27, 1  ;;  %s907_s9 = smov (!%p301_p3), 32  }
   0x7   : > { %304 = sbr.rel (%p301_p3) target bundleno = 682 (0x2aa), region = 52  ;;  %s908_s12 = smov (!%p301_p3), 64  }
   0xc   : > { %v869_v0 = vld [vmem:[%s1078_s2 + $0x28] sm:$0xff]   ;;  %v905_v1 = vmov 0.0   ;;  %s1090_s27 = smov (!%p348_p4, %s895_s27), 1  ;;  %v870_v2 = vld [vmem:[%s1078_s2 + $0x20] sm:$0xff]   ;;  %vm380_vm0 = vcmask 1046528   ;;  %vm390_vm1 = vcmask 1045504  }
   0xd   : > { %799 = vmatprep.subr.bf16.mxu0 %v905_v1  ;;  %815 = vmatprep.subr.bf16.mxu1 %v905_v1  ;;  %s781_s13 = sshll.u32 %s1090_s27, 3  ;;  %v871_v4 = vld [vmem:[%s1078_s2 + $0x18] sm:$0xff]   ;;  %v872_v10 = vld [vmem:[%s1078_s2 + $0x10] sm:$0xff]   ;;  %vm906_vm2 = vmmov 0   ;;  %v873_v16 = vld [vmem:[%s1078_s2 + $0x8] sm:$0xff]   ;;  %vm400_vm3 = vcmask 261120  }
   0xe   : > { %800 = vmatpush3.bf16.msra.mxu0 %v869_v0  ;;  %s355_s16 = scalar_lea.vmem %s1076_s0, %s781_s13  ;;  %s783_s17 = sadd.s32 4, %s781_s13  ;;  %811 = vmatprep.mubr.msk.bf16.mxu0 %vm906_vm2, %v905_v1  ;;  %v874_v18 = vld [vmem:[%s1078_s2] sm:$0xff]   ;;  %vm403_vm4 = vcmask 523264   ;;  %vm455_vm5 = vcmask 785408   ;;  %v875_v30 = vld [vmem:[%s1081_s5 + $0x28] sm:$0xff]   ;;  %v877_v32 = vld [vmem:[%s1081_s5 + $0x18] sm:$0xff]  }
   0xf   : > { %801 = vmatprep.subr.bf16.mxu0 %v905_v1  ;;  %s364_s20 = scalar_lea.vmem %s1077_s1, %s783_s17  ;;  %v374_v3 = vld [vmem:[%s355_s16] sm:$0xf]  ;;  %827 = vmatprep.mubr.msk.bf16.mxu1 %vm906_vm2, %v905_v1  ;;  %v878_v33 = vld [vmem:[%s1081_s5 + $0x10] sm:$0xff]   ;;  %v879_v37 = vld [vmem:[%s1081_s5 + $0x8] sm:$0xff]   ;;  %vm654_vm9 = vcmask 257024  }
  0x10   : > { %v375_v5 = vunpack.c.l.bf16 %v374_v3  ;;  %v376_v6 = vld [vmem:[%s364_s20] sm:$0xf]  ;;  %816 = vmatpush3.bf16.msra.mxu1 %v875_v30 }
  0x11   : > { %v377_v7 = vunpack.c.l.bf16 %v376_v6  ;;  %v876_v31 = vld [vmem:[%s1081_s5 + $0x20] sm:$0xff]   ;;  %817 = vmatprep.subr.bf16.mxu1 %v905_v1 }
  0x12   : > { %802 = vmatpush3.bf16.msra.mxu0 %v870_v2  ;;  %v381_v8 = vrot.slane %v375_v5, 1  ;;  %v391_v9 = vrot.slane %v375_v5, 2  ;;  %v768_v34 = vld [vmem:[%s1079_s3] ss:$0 sm:$0xff] }
  0x13   : > { %803 = vmatprep.subr.bf16.mxu0 %v905_v1  ;;  %v382_v11 = vrot.slane %v377_v7, 1  ;;  %v392_v12 = vrot.slane %v377_v7, 2  ;;  %v769_v36 = vld [vmem:[%s1080_s4] ss:$0 sm:$0xff] }
  0x14   : > { %818 = vmatpush3.bf16.msra.mxu1 %v876_v31  ;;  %v880_v42 = vld [vmem:[%s1081_s5] sm:$0xff]  }
  0x15   : > { %v383_v13 = vsel %vm380_vm0, %v381_v8, %v382_v11  ;;  %v1002_v14 = vsel %vm390_vm1, %v391_v9, %v392_v12  ;;  %819 = vmatprep.subr.bf16.mxu1 %v905_v1  ;;  %v777_v61 = vld [vmem:[%s1082_s6] ss:$0 sm:$0xff] }
  0x16   : > { %804 = vmatpush3.bf16.msra.mxu0 %v871_v4  ;;  %v859_v15 = vpack.i.bf16 %v382_v11, %v383_v13  ;;  %v864_v17 = vpack.i.bf16 %v392_v12, %v1002_v14  ;;  %v778_v63 = vld [vmem:[%s1083_s7] ss:$0 sm:$0xff] }
  0x17   : > { %805 = vmatprep.subr.bf16.mxu0 %v905_v1 }
  0x18   : > { %860 = vrot.lane.b32.xlu0 %v859_v15, %s907_s9  ;;  %820 = vmatpush3.bf16.msra.mxu1 %v877_v32 }
  0x19   : > { %821 = vmatprep.subr.bf16.mxu1 %v905_v1 }
  0x1a   : > { %806 = vmatpush3.bf16.msra.mxu0 %v872_v10 }
  0x1b   : > { %807 = vmatprep.subr.bf16.mxu0 %v905_v1 }
  0x1c   : > { %865 = vrot.lane.b32.xlu0 %v864_v17, %s908_s12  ;;  %822 = vmatpush3.bf16.msra.mxu1 %v878_v33 }
  0x1d   : > { %823 = vmatprep.subr.bf16.mxu1 %v905_v1 }
  0x1e   : > { %808 = vmatpush3.bf16.msra.mxu0 %v873_v16 }
  0x1f   : > { %809 = vmatprep.subr.bf16.mxu0 %v905_v1 }
  0x20   : > { %824 = vmatpush3.bf16.msra.mxu1 %v879_v37 }
  0x21   : > { %825 = vmatprep.subr.bf16.mxu1 %v905_v1 }
  0x22   : > { %810 = vmatpush3.bf16.msra.mxu0 %v874_v18 }
  0x24   : > { %826 = vmatpush3.bf16.msra.mxu1 %v880_v42 }
  0x8a   : > { %v861_v19 = vpop.permute.xlu0 %860 }
  0x8b   : > { %v863_v20 = vunpack.i.h.bf16 %v861_v19  ;;  %v862_v21 = vunpack.i.l.bf16 %v861_v19 }
  0x8d   : > { %v402_v25 = vsel %vm400_vm3, %v377_v7, %v863_v20  ;;  %v401_v26 = vsel %vm400_vm3, %v375_v5, %v862_v21 }
  0x8e   : > { %v866_v22 = vpop.permute.xlu0 %865 }
  0x8f   : > { %v868_v23 = vunpack.i.h.bf16 %v866_v22  ;;  %v867_v24 = vunpack.i.l.bf16 %v866_v22 }
  0x91   : > { %v404_v27 = vsel %vm403_vm4, %v401_v26, %v867_v24  ;;  %v405_v28 = vsel %vm403_vm4, %v402_v25, %v868_v23 }
  0x92   : > { %v406_v29 = vpack.c.bf16 %v405_v28, %v404_v27 }
  0x94   : > { %812 = vmatmul.mubr.msk.bf16.vlgmr.msra.gmra.mxu0 %vm455_vm5, %v406_v29 }
 0x154   : > { %v493_v35 = vpop.f32.mrf.mxu0 }
 0x155   : > { %v507_v38 = vmul.f32 %v768_v34, %v493_v35 }
 0x156   : > { %v813_v39 = vpop.f32.mrf.mxu0 }
 0x157   : > { %v516_v40 = vadd.f32 %v769_v36, %v507_v38 }
 0x158   : > { %v496_v41 = vpop.f32.mrf.mxu0 }
 0x159   : > { %v520_v43 = vmul.f32 0.2, %v516_v40  ;;  %v508_v44 = vmul.f32 %v768_v34, %v496_v41  ;;  %vm518_vm6 = vcmp.gt.f32.partialorder %v516_v40, 0.0 }
 0x15a   : > { %v814_v45 = vpop.f32.mrf.mxu0 }
 0x15b   : > { %v517_v46 = vadd.f32 %v769_v36, %v508_v44  ;;  %v522_v47 = vsel %vm518_vm6, %v516_v40, %v520_v43 }
 0x15c   : > { %v526_v50 = vrot.slane %v522_v47, 1  ;;  %v532_v54 = vrot.slane %v522_v47, 2 }
 0x15d   : > { %vm519_vm7 = vcmp.gt.f32.partialorder %v517_v46, 0.0  ;;  %v521_v48 = vmul.f32 0.2, %v517_v46 }
 0x15f   : > { %v523_v49 = vsel %vm519_vm7, %v517_v46, %v521_v48 }
 0x160   : > { %v527_v51 = vrot.slane %v523_v49, 1  ;;  %v533_v53 = vrot.slane %v523_v49, 2 }
 0x162   : > { %v528_v52 = vsel %vm380_vm0, %v526_v50, %v527_v51  ;;  %v534_v55 = vsel %vm390_vm1, %v532_v54, %v533_v53 }
 0x163   : > { %529 = vrot.lane.b32.xlu1 %v528_v52, %s907_s9 }
 0x167   : > { %535 = vrot.lane.b32.xlu1 %v534_v55, %s908_s12  ;;  %s760_s12 = sshll.u32 %s1090_s27, 2 }
 0x168   : > { %s372_s18 = scalar_lea.vmem %s1084_s8, %s760_s12 }
 0x1d5   : > { %v530_v56 = vpop.permute.xlu1 %529 }
 0x1d6   : > { %v538_v57 = vsel %vm400_vm3, %v522_v47, %v530_v56 }
 0x1d9   : > { %v536_v58 = vpop.permute.xlu1 %535 }
 0x1da   : > { %v539_v59 = vsel %vm403_vm4, %v538_v57, %v536_v58 }
 0x1db   : > { %v540_v60 = vpack.c.bf16 %v539_v59, %v539_v59 }
 0x1dd   : > { %828 = vmatmul.mubr.msk.bf16.vlgmr.msra.gmra.mxu1 %vm455_vm5, %v540_v60 }
 0x29d   : > { %v626_v62 = vpop.f32.mrf.mxu1 }
 0x29e   : > { %v639_v0 = vmul.f32 %v777_v61, %v626_v62 }
 0x29f   : > { %v829_v1 = vpop.f32.mrf.mxu1 }
 0x2a0   : > { %v647_v2 = vadd.f32 %v778_v63, %v639_v0 }
 0x2a1   : > { %v629_v3 = vpop.f32.mrf.mxu1 }
 0x2a2   : > { %v649_v4 = vadd.f32 %v647_v2, %v1002_v14 }
 0x2a3   : > { %v830_v5 = vpop.f32.mrf.mxu1 }
 0x2a4   : > { %vm650_vm8 = vcmp.gt.f32.partialorder %v649_v4, 0.0  ;;  %v651_v6 = vmul.f32 0.2, %v649_v4 }
 0x2a6   : > { %v652_v7 = vsel %vm650_vm8, %v649_v4, %v651_v6 }
 0x2a7   : > { %v653_v8 = vpack.c.bf16 %v652_v7, %v652_v7 }
 0x2a9   : > { %655 = vst.msk [vmem:[%s372_s18] sm:$0xf] %vm654_vm9, %v653_v8 }
 0x2aa PF: > { %s18_s29 = sadd.s32 1, %s903_s29   ;;  %s1085_s27 = smov %s899_s28 }
 0x2ab   : > { %p15_p5 = scmp.ge.s32.totalorder %s18_s29, 4   ;;  %s1086_s28 = smov %s1088_s30 }
 0x2ad   :  { %17 = sbr.rel (!%p15_p5) target bundleno = 2 (0x2), region = 85 }

// kernel: encoder_forward.14
= control target key start
LH: loop header
LB: loop body
LE: loop exit
PB: predicated region body
PF: predicated region fallthrough
CT: control target
= control target key end

     0   :  { %s954_s27 = smov 0   ;;  %s956_s28 = smov 0   ;;  %s1076_s0 = inlined_call_operand.vmem [shape: bf16[2,16,32], index: 0, kind: input, shape index: {}, may-alias: {0,1}]   ;;  %s1077_s1 = inlined_call_operand.vmem [shape: bf16[2,16,32], index: 1, kind: input, shape index: {}, may-alias: {0,1}]   ;;  %s1078_s2 = inlined_call_operand.vmem [shape: bf16[96,32], index: 2, kind: input, shape index: {}]   ;;  %s1079_s3 = inlined_call_operand.vmem [shape: f32[1,32], index: 3, kind: input, shape index: {}]   ;;  %s1080_s4 = inlined_call_operand.vmem [shape: f32[1,32], index: 4, kind: input, shape index: {}]   ;;  %s1081_s5 = inlined_call_operand.vmem [shape: bf16[96,32], index: 5, kind: input, shape index: {}]   ;;  %s1082_s6 = inlined_call_operand.vmem [shape: f32[1,32], index: 6, kind: input, shape index: {}]   ;;  %s1083_s7 = inlined_call_operand.vmem [shape: f32[1,32], index: 7, kind: input, shape index: {}]   ;;  %s1084_s8 = inlined_call_operand.vmem [shape: bf16[2,8,32], index: 8, kind: output, shape index: {}]  }
   0x1   :  { %s958_s29 = smov 0  }
   0x2 LB: > { %s30_s30 = sadd.s32 1, %s899_s28  ;;  %p755_p0 = scmp.ge.s32.totalorder %s903_s29, 1  ;;  %s903_s29 = sphi %s958_s29, %s18_s29   ;;  %s899_s28 = sphi %s956_s28, %s1086_s28   ;;  %s895_s27 = sphi %s954_s27, %s1085_s27  }
   0x3   : > { %p32_p1 = scmp.ge.s32.totalorder %s30_s30, 2  ;;  %p300_p2 = scmp.lt.s32.totalorder %s903_s29, 3 }
   0x5   : > { %s1088_s30 = smov (%p32_p1, %s30_s30), 0  ;;  %p301_p3 = pnand %p755_p0, %p300_p2 }
   0x6   : > { %p348_p4 = scmp.lt.s32.totalorder (!%p301_p3), %s895_s27, 1  ;;  %s907_s9 = smov (!%p301_p3), 32  }
   0x7   : > { %304 = sbr.rel (%p301_p3) target bundleno = 682 (0x2aa), region = 52  ;;  %s908_s12 = smov (!%p301_p3), 64  }
   0xc   : > { %v869_v0 = vld [vmem:[%s1078_s2 + $0x28] sm:$0xff]   ;;  %v905_v1 = vmov 0.0   ;;  %s1090_s27 = smov (!%p348_p4, %s895_s27), 1  ;;  %v870_v2 = vld [vmem:[%s1078_s2 + $0x20] sm:$0xff]   ;;  %vm380_vm0 = vcmask 1045504   ;;  %vm390_vm1 = vcmask 1043456  }
   0xd   : > { %799 = vmatprep.subr.bf16.mxu0 %v905_v1  ;;  %815 = vmatprep.subr.bf16.mxu1 %v905_v1  ;;  %s781_s13 = sshll.u32 %s1090_s27, 3  ;;  %v871_v4 = vld [vmem:[%s1078_s2 + $0x18] sm:$0xff]   ;;  %v872_v10 = vld [vmem:[%s1078_s2 + $0x10] sm:$0xff]   ;;  %vm906_vm2 = vmmov 0   ;;  %v873_v16 = vld [vmem:[%s1078_s2 + $0x8] sm:$0xff]   ;;  %vm400_vm3 = vcmask 261120  }
   0xe   : > { %800 = vmatpush3.bf16.msra.mxu0 %v869_v0  ;;  %s355_s16 = scalar_lea.vmem %s1076_s0, %s781_s13  ;;  %s783_s17 = sadd.s32 4, %s781_s13  ;;  %811 = vmatprep.mubr.msk.bf16.mxu0 %vm906_vm2, %v905_v1  ;;  %v874_v18 = vld [vmem:[%s1078_s2] sm:$0xff]   ;;  %vm403_vm4 = vcmask 523264   ;;  %vm455_vm5 = vcmask 785408   ;;  %v875_v30 = vld [vmem:[%s1081_s5 + $0x28] sm:$0xff]   ;;  %v877_v32 = vld [vmem:[%s1081_s5 + $0x18] sm:$0xff]  }
   0xf   : > { %801 = vmatprep.subr.bf16.mxu0 %v905_v1  ;;  %s364_s20 = scalar_lea.vmem %s1077_s1, %s783_s17  ;;  %v374_v3 = vld [vmem:[%s355_s16] sm:$0xf]  ;;  %827 = vmatprep.mubr.msk.bf16.mxu1 %vm906_vm2, %v905_v1  ;;  %v878_v33 = vld [vmem:[%s1081_s5 + $0x10] sm:$0xff]   ;;  %v879_v37 = vld [vmem:[%s1081_s5 + $0x8] sm:$0xff]   ;;  %vm654_vm9 = vcmask 257024  }
  0x10   : > { %v375_v5 = vunpack.c.l.bf16 %v374_v3  ;;  %v376_v6 = vld [vmem:[%s364_s20] sm:$0xf]  ;;  %816 = vmatpush3.bf16.msra.mxu1 %v875_v30 }
  0x11   : > { %v377_v7 = vunpack.c.l.bf16 %v376_v6  ;;  %v876_v31 = vld [vmem:[%s1081_s5 + $0x20] sm:$0xff]   ;;  %817 = vmatprep.subr.bf16.mxu1 %v905_v1 }
  0x12   : > { %802 = vmatpush3.bf16.msra.mxu0 %v870_v2  ;;  %v381_v8 = vrot.slane %v375_v5, 2  ;;  %v391_v9 = vrot.slane %v375_v5, 4  ;;  %v768_v34 = vld [vmem:[%s1079_s3] ss:$0 sm:$0xff] }
  0x13   : > { %803 = vmatprep.subr.bf16.mxu0 %v905_v1  ;;  %v382_v11 = vrot.slane %v377_v7, 2  ;;  %v392_v12 = vrot.slane %v377_v7, 4  ;;  %v769_v36 = vld [vmem:[%s1080_s4] ss:$0 sm:$0xff] }
  0x14   : > { %818 = vmatpush3.bf16.msra.mxu1 %v876_v31  ;;  %v880_v42 = vld [vmem:[%s1081_s5] sm:$0xff]  }
  0x15   : > { %v383_v13 = vsel %vm380_vm0, %v381_v8, %v382_v11  ;;  %v1002_v14 = vsel %vm390_vm1, %v391_v9, %v392_v12  ;;  %819 = vmatprep.subr.bf16.mxu1 %v905_v1  ;;  %v777_v61 = vld [vmem:[%s1082_s6] ss:$0 sm:$0xff] }
  0x16   : > { %804 = vmatpush3.bf16.msra.mxu0 %v871_v4  ;;  %v859_v15 = vpack.i.bf16 %v382_v11, %v383_v13  ;;  %v864_v17 = vpack.i.bf16 %v392_v12, %v1002_v14  ;;  %v778_v63 = vld [vmem:[%s1083_s7] ss:$0 sm:$0xff] }
  0x17   : > { %805 = vmatprep.subr.bf16.mxu0 %v905_v1 }
  0x18   : > { %860 = vrot.lane.b32.xlu0 %v859_v15, %s907_s9  ;;  %820 = vmatpush3.bf16.msra.mxu1 %v877_v32 }
  0x19   : > { %821 = vmatprep.subr.bf16.mxu1 %v905_v1 }
  0x1a   : > { %806 = vmatpush3.bf16.msra.mxu0 %v872_v10 }
  0x1b   : > { %807 = vmatprep.subr.bf16.mxu0 %v905_v1 }
  0x1c   : > { %865 = vrot.lane.b32.xlu0 %v864_v17, %s908_s12  ;;  %822 = vmatpush3.bf16.msra.mxu1 %v878_v33 }
  0x1d   : > { %823 = vmatprep.subr.bf16.mxu1 %v905_v1 }
  0x1e   : > { %808 = vmatpush3.bf16.msra.mxu0 %v873_v16 }
  0x1f   : > { %809 = vmatprep.subr.bf16.mxu0 %v905_v1 }
  0x20   : > { %824 = vmatpush3.bf16.msra.mxu1 %v879_v37 }
  0x21   : > { %825 = vmatprep.subr.bf16.mxu1 %v905_v1 }
  0x22   : > { %810 = vmatpush3.bf16.msra.mxu0 %v874_v18 }
  0x24   : > { %826 = vmatpush3.bf16.msra.mxu1 %v880_v42 }
  0x8a   : > { %v861_v19 = vpop.permute.xlu0 %860 }
  0x8b   : > { %v863_v20 = vunpack.i.h.bf16 %v861_v19  ;;  %v862_v21 = vunpack.i.l.bf16 %v861_v19 }
  0x8d   : > { %v402_v25 = vsel %vm400_vm3, %v377_v7, %v863_v20  ;;  %v401_v26 = vsel %vm400_vm3, %v375_v5, %v862_v21 }
  0x8e   : > { %v866_v22 = vpop.permute.xlu0 %865 }
  0x8f   : > { %v868_v23 = vunpack.i.h.bf16 %v866_v22  ;;  %v867_v24 = vunpack.i.l.bf16 %v866_v22 }
  0x91   : > { %v404_v27 = vsel %vm403_vm4, %v401_v26, %v867_v24  ;;  %v405_v28 = vsel %vm403_vm4, %v402_v25, %v868_v23 }
  0x92   : > { %v406_v29 = vpack.c.bf16 %v405_v28, %v404_v27 }
  0x94   : > { %812 = vmatmul.mubr.msk.bf16.vlgmr.msra.gmra.mxu0 %vm455_vm5, %v406_v29 }
 0x154   : > { %v493_v35 = vpop.f32.mrf.mxu0 }
 0x155   : > { %v507_v38 = vmul.f32 %v768_v34, %v493_v35 }
 0x156   : > { %v813_v39 = vpop.f32.mrf.mxu0 }
 0x157   : > { %v516_v40 = vadd.f32 %v769_v36, %v507_v38 }
 0x158   : > { %v496_v41 = vpop.f32.mrf.mxu0 }
 0x159   : > { %v520_v43 = vmul.f32 0.2, %v516_v40  ;;  %v508_v44 = vmul.f32 %v768_v34, %v496_v41  ;;  %vm518_vm6 = vcmp.gt.f32.partialorder %v516_v40, 0.0 }
 0x15a   : > { %v814_v45 = vpop.f32.mrf.mxu0 }
 0x15b   : > { %v517_v46 = vadd.f32 %v769_v36, %v508_v44  ;;  %v522_v47 = vsel %vm518_vm6, %v516_v40, %v520_v43 }
 0x15c   : > { %v526_v50 = vrot.slane %v522_v47, 2  ;;  %v532_v54 = vrot.slane %v522_v47, 4 }
 0x15d   : > { %vm519_vm7 = vcmp.gt.f32.partialorder %v517_v46, 0.0  ;;  %v521_v48 = vmul.f32 0.2, %v517_v46 }
 0x15f   : > { %v523_v49 = vsel %vm519_vm7, %v517_v46, %v521_v48 }
 0x160   : > { %v527_v51 = vrot.slane %v523_v49, 2  ;;  %v533_v53 = vrot.slane %v523_v49, 4 }
 0x162   : > { %v528_v52 = vsel %vm380_vm0, %v526_v50, %v527_v51  ;;  %v534_v55 = vsel %vm390_vm1, %v532_v54, %v533_v53 }
 0x163   : > { %529 = vrot.lane.b32.xlu1 %v528_v52, %s907_s9 }
 0x167   : > { %535 = vrot.lane.b32.xlu1 %v534_v55, %s908_s12  ;;  %s760_s12 = sshll.u32 %s1090_s27, 2 }
 0x168   : > { %s372_s18 = scalar_lea.vmem %s1084_s8, %s760_s12 }
 0x1d5   : > { %v530_v56 = vpop.permute.xlu1 %529 }
 0x1d6   : > { %v538_v57 = vsel %vm400_vm3, %v522_v47, %v530_v56 }
 0x1d9   : > { %v536_v58 = vpop.permute.xlu1 %535 }
 0x1da   : > { %v539_v59 = vsel %vm403_vm4, %v538_v57, %v536_v58 }
 0x1db   : > { %v540_v60 = vpack.c.bf16 %v539_v59, %v539_v59 }
 0x1dd   : > { %828 = vmatmul.mubr.msk.bf16.vlgmr.msra.gmra.mxu1 %vm455_vm5, %v540_v60 }
 0x29d   : > { %v626_v62 = vpop.f32.mrf.mxu1 }
 0x29e   : > { %v639_v0 = vmul.f32 %v777_v61, %v626_v62 }
 0x29f   : > { %v829_v1 = vpop.f32.mrf.mxu1 }
 0x2a0   : > { %v647_v2 = vadd.f32 %v778_v63, %v639_v0 }
 0x2a1   : > { %v629_v3 = vpop.f32.mrf.mxu1 }
 0x2a2   : > { %v649_v4 = vadd.f32 %v647_v2, %v1002_v14 }
 0x2a3   : > { %v830_v5 = vpop.f32.mrf.mxu1 }
 0x2a4   : > { %vm650_vm8 = vcmp.gt.f32.partialorder %v649_v4, 0.0  ;;  %v651_v6 = vmul.f32 0.2, %v649_v4 }
 0x2a6   : > { %v652_v7 = vsel %vm650_vm8, %v649_v4, %v651_v6 }
 0x2a7   : > { %v653_v8 = vpack.c.bf16 %v652_v7, %v652_v7 }
 0x2a9   : > { %655 = vst.msk [vmem:[%s372_s18] sm:$0xf] %vm654_vm9, %v653_v8 }
 0x2aa PF: > { %s18_s29 = sadd.s32 1, %s903_s29   ;;  %s1085_s27 = smov %s899_s28 }
 0x2ab   : > { %p15_p5 = scmp.ge.s32.totalorder %s18_s29, 4   ;;  %s1086_s28 = smov %s1088_s30 }
 0x2ad   :  { %17 = sbr.rel (!%p15_p5) target bundleno = 2 (0x2), region = 85 }

</bundles_post_ra>
